<compile_context>
chip_gen: v5e
topology: v5e:2x2
jax: 0.10.0
libtpu: 0.0.40
codegen_flags: <defaults>
</compile_context>

<pallas_src>
import functools

import numpy as np
import jax
import jax.numpy as jnp
from jax.experimental import pallas as pl
from jax.experimental.pallas import tpu as pltpu


HEAD_PAD = 128  # lane-dense padded width for the task-head outputs (reg1/reg2/cls)


# ----------------------------------------------------------------------------- kernel
def _fused_branches_kernel(h_ref, elT_ref, adjT_ref, ns_ref, nd_ref, relu_ref,
                           fcw_ref, wr_ref, gb_ref,
                           caw_ref, cab_ref, c2w_ref, c2b_ref, hw_ref, hb_ref,
                           head_ref, att_ref, hg_ref, x_ref,
                           *, num_heads):
    """One grid step == one graph branch.
       GATConv (per-head fc -> leaky-relu logits -> edge softmax over incoming edges
       -> attention-weighted aggregation -> +bias) -> max over heads
       [-> ReLU, branch 0 only] -> GraphConv(norm='both')+ReLU -> GraphConv+ReLU
       -> mean_nodes -> (padded) Linear head.
       adjT is A^T: adjT[v, u] == 1 iff edge u -> v (dst-major)."""
    h = h_ref[...]                               # (N, F)   feature-padded node feats
    adjT = adjT_ref[...]                         # (N_dst, N_src)
    ns = ns_ref[...]                             # (N, 1)   out-degree^-1/2 (src norm)
    nd = nd_ref[...]                             # (N, 1)   in-degree^-1/2  (dst norm)
    elT = elT_ref[...]                           # (H, N)   src attention scores (pre-folded)
    gb = gb_ref[...]                             # (H, F)   GAT bias per head
    relu_flag = relu_ref[...]                    # (1, 1)   1.0 only for branch 0 (g1)

    # Destination-side attention scores for all heads at once: er = h @ wr -> (N, H).
    er = jnp.dot(h, wr_ref[...], preferred_element_type=jnp.float32)

    x = None                                     # max over heads of rst
    att = None                                   # max over heads of alpha (dst, src)
    for hh in range(num_heads):                  # static unroll (3 heads)
        # Lane-aligned per-head projection: (N,F) @ (F,F) slab (no unaligned slicing).
        feat_h = jnp.dot(h, fcw_ref[hh], preferred_element_type=jnp.float32)
        # logits[v, u] = el[u] + er[v]   (dst-major, matches adjT)
        logits = er[:, hh:hh + 1] + elT[hh:hh + 1, :]                        # (N, N)
        e = jnp.where(logits >= 0.0, logits, 0.2 * logits)                   # LeakyReLU(0.2)
        e = jnp.where(adjT > 0.0, e, jnp.float32(-1e30))                     # mask non-edges
        m = jnp.max(e, axis=-1, keepdims=True)                               # lane reduce
        # Masked entries sit at -1e30, so exp underflows to exactly 0 -> no `* adjT`
        # pass needed (self-loops guarantee a finite per-row max).
        p = jnp.exp(e - m)
        d = jnp.sum(p, axis=-1, keepdims=True)
        alpha = p / jnp.maximum(d, jnp.float32(1e-30))                       # exact divide
        # rst[v, f] = sum_u alpha[v, u] * feat[u, f]; bf16 MXU operands, f32 accumulate.
        rst = jnp.dot(alpha.astype(jnp.bfloat16), feat_h.astype(jnp.bfloat16),
                      preferred_element_type=jnp.float32)
        rst = rst + gb[hh:hh + 1, :]                                         # GAT bias
        x = rst if x is None else jnp.maximum(x, rst)                        # head max
        att = alpha if att is None else jnp.maximum(att, alpha)

    att_ref[...] = att                           # f32 head-max attention map (dst, src)

    # Branch-dependent ReLU after the head max (branch 0 == g1 only); arithmetic blend
    # avoids any control flow on the node-feature value.
    x = relu_flag * jnp.maximum(x, 0.0) + (1.0 - relu_flag) * x

    adjT_bf = adjT.astype(jnp.bfloat16)

    # ---- two GraphConv layers (DGL norm='both') + ReLU ------------------------------
    def gconv(xin, w, b):
        xs = (xin * ns).astype(jnp.bfloat16)                                 # src norm
        agg = jnp.dot(adjT_bf, xs, preferred_element_type=jnp.float32)       # sum_{u->v}
        agg = agg * nd                                                       # dst norm
        y = jnp.dot(agg.astype(jnp.bfloat16), w.astype(jnp.bfloat16),
                    preferred_element_type=jnp.float32) + b
        return jnp.maximum(y, 0.0)

    x = gconv(x, caw_ref[...], cab_ref[...])     # conv3 (g1/g2) or conv1 (g3)
    x = gconv(x, c2w_ref[...], c2b_ref[...])     # conv2 (shared)

    # ---- lane-dense outputs: full node block, readout, padded task head --------------
    x_ref[...] = x                                                           # (N, 128)
    hg = jnp.mean(x, axis=0, keepdims=True)                                  # (1, 128)
    hg_ref[...] = hg
    head_ref[...] = (jnp.dot(hg, hw_ref[...], preferred_element_type=jnp.float32)
                     + hb_ref[...])                                          # (1, 128)


# ----------------------------------------------------------------------------- wrapper
def _graph_prep(adj):
    """A^T plus DGL norm='both' degree scalings (clamp(min=1))."""
    adjT = adj.T
    ns = jax.lax.rsqrt(jnp.maximum(jnp.sum(adj, axis=1), 1.0))[:, None]   # out-deg^-1/2
    nd = jax.lax.rsqrt(jnp.maximum(jnp.sum(adj, axis=0), 1.0))[:, None]   # in-deg^-1/2
    return adjT, ns, nd


def _gat_prep(fc_w, attn_l, attn_r, bias, fin, fout, num_heads):
    """Weight-only folds (fused by XLA under jit):
         wl[i, h] = sum_f fc_w[i, h*F + f] * attn_l[h, f]   (so el = h @ wl)
         fcw      = (H, Fin, F) per-head projection slabs."""
    fc3 = fc_w.reshape(fin, num_heads, fout)
    wl = jnp.einsum("ihf,hf->ih", fc3, attn_l)          # (Fin, H)
    wr = jnp.einsum("ihf,hf->ih", fc3, attn_r)          # (Fin, H)
    fcw = jnp.transpose(fc3, (1, 0, 2))                 # (H, Fin, F)
    gb = bias.reshape(num_heads, fout)                  # (H, F)
    return wl, wr, fcw, gb


def _branch_spec(tail_shape):
    """Branch-stacked input/output: leading branch dim squeezed, rest delivered whole."""
    k = len(tail_shape)
    return pl.BlockSpec((None,) + tuple(tail_shape), lambda b, _k=k: (b,) + (0,) * _k)


def _shared_spec(shape2):
    """Branch-invariant 2-D weight: same block for every grid step."""
    return pl.BlockSpec(tuple(shape2), lambda b: (0, 0))


def multi_task_gnn_forward(params, g1, g2, g3, h1, h2, h3, *,
                           in_dim, num_heads=3, weight_index=78):
    adj1, src1, dst1 = g1
    adj2, src2, dst2 = g2
    adj3, src3, dst3 = g3
    F = in_dim
    f1 = in_dim - 1
    dF = F - f1
    n = h1.shape[0]
    assert h2.shape[0] == n and h3.shape[0] == n, "branches are stacked; equal N required"
    hidden = params["conv2_w"].shape[0]
    r1 = params["reg1_w"].shape[1]
    r2 = params["reg2_w"].shape[1]
    nc = params["cls_w"].shape[1]

    # ---- per-graph prep --------------------------------------------------------------
    adjT1, ns1, nd1 = _graph_prep(adj1)
    adjT2, ns2, nd2 = _graph_prep(adj2)
    adjT3, ns3, nd3 = _graph_prep(adj3)

    # ---- GAT weight folds; branches 0/1 share gatconv1, branch 2 uses gatconv2 --------
    wl1, wr1, fcw1, gb1 = _gat_prep(params["gat1_fc"], params["gat1_al"],
                                    params["gat1_ar"], params["gat1_b"], f1, f1, num_heads)
    wl3, wr3, fcw3, gb3 = _gat_prep(params["gat2_fc"], params["gat2_al"],
                                    params["gat2_ar"], params["gat2_b"], F, F, num_heads)

    # Pad the (in_dim-1)-wide branch tensors to in_dim so all branches share one shape.
    # Zero-padded feature columns / weight rows contribute exactly nothing downstream.
    h1p = jnp.pad(h1, ((0, 0), (0, dF)))
    h2p = jnp.pad(h2, ((0, 0), (0, dF)))
    fcw1p = jnp.pad(fcw1, ((0, 0), (0, dF), (0, dF)))
    wr1p = jnp.pad(wr1, ((0, dF), (0, 0)))
    gb1p = jnp.pad(gb1, ((0, 0), (0, dF)))
    c3p = jnp.pad(params["conv3_w"], ((0, dF), (0, 0)))

    # Pre-folded src attention rows (el = h @ wl, transposed outside the kernel) — this
    # replaces the old duplicated h.T input and avoids any in-kernel transpose.
    elT_s = jnp.stack([(h1 @ wl1).T, (h2 @ wl1).T, (h3 @ wl3).T])            # (3, H, N)

    # ---- branch-stacked inputs ---------------------------------------------------------
    h_s = jnp.stack([h1p, h2p, h3])                                          # (3, N, F)
    adjT_s = jnp.stack([adjT1, adjT2, adjT3])                                # (3, N, N)
    ns_s = jnp.stack([ns1, ns2, ns3])                                        # (3, N, 1)
    nd_s = jnp.stack([nd1, nd2, nd3])                                        # (3, N, 1)
    relu_s = jnp.array([[[1.0]], [[0.0]], [[0.0]]], jnp.float32)             # (3, 1, 1)
    fcw_s = jnp.stack([fcw1p, fcw1p, fcw3])                                  # (3, H, F, F)
    wr_s = jnp.stack([wr1p, wr1p, wr3])                                      # (3, F, H)
    gb_s = jnp.stack([gb1p, gb1p, gb3])                                      # (3, H, F)
    caw_s = jnp.stack([c3p, c3p, params["conv1_w"]])                         # (3, F, hidden)
    cab_s = jnp.stack([params["conv3_b"], params["conv3_b"], params["conv1_b"]])
    c2w = params["conv2_w"]                                                  # (hidden, hidden)
    c2b = params["conv2_b"]                                                  # (1, hidden)

    def pad_head(w, b):
        return (jnp.pad(w, ((0, 0), (0, HEAD_PAD - w.shape[1]))),
                jnp.pad(b, ((0, 0), (0, HEAD_PAD - b.shape[1]))))

    hw1, hb1 = pad_head(params["reg1_w"], params["reg1_b"])
    hw2, hb2 = pad_head(params["reg2_w"], params["reg2_b"])
    hw3, hb3 = pad_head(params["cls_w"], params["cls_b"])
    hw_s = jnp.stack([hw1, hw2, hw3])                                        # (3, hidden, 128)
    hb_s = jnp.stack([hb1, hb2, hb3])                                        # (3, 1, 128)

    # ---- fused pallas_call: grid over branches, marked "parallel" for v7x megacore ----
    out_shape = (
        jax.ShapeDtypeStruct((3, 1, HEAD_PAD), jnp.float32),   # task heads (padded)
        jax.ShapeDtypeStruct((3, n, n), jnp.float32),          # head-max attention maps
        jax.ShapeDtypeStruct((3, 1, hidden), jnp.float32),     # mean_nodes readouts
        jax.ShapeDtypeStruct((3, n, hidden), jnp.float32),     # final node features
    )
    in_specs = [
        _branch_spec((n, F)),              # h_s
        _branch_spec((num_heads, n)),      # elT_s
        _branch_spec((n, n)),              # adjT_s
        _branch_spec((n, 1)),              # ns_s
        _branch_spec((n, 1)),              # nd_s
        _branch_spec((1, 1)),              # relu_s
        _branch_spec((num_heads, F, F)),   # fcw_s
        _branch_spec((F, num_heads)),      # wr_s
        _branch_spec((num_heads, F)),      # gb_s
        _branch_spec((F, hidden)),         # caw_s
        _branch_spec((1, hidden)),         # cab_s
        _shared_spec((hidden, hidden)),    # conv2_w (shared by all branches)
        _shared_spec((1, hidden)),         # conv2_b
        _branch_spec((hidden, HEAD_PAD)),  # hw_s
        _branch_spec((1, HEAD_PAD)),       # hb_s
    ]
    out_specs = (
        _branch_spec((1, HEAD_PAD)),
        _branch_spec((n, n)),
        _branch_spec((1, hidden)),
        _branch_spec((n, hidden)),
    )

    H = num_heads
    flops_per_branch = (
        2 * n * F * H                                              # er
        + H * (2 * n * F * F + 6 * n * n + 2 * n * n * F)          # fc / softmax / agg
        + (2 * n * n * F + 2 * n * F * hidden)                     # first GraphConv
        + (2 * n * n * hidden + 2 * n * hidden * hidden)           # second GraphConv
        + 2 * hidden * HEAD_PAD)                                   # task head
    in_bytes = 4 * sum(int(np.prod(s)) for s in
                       [(3, n, F), (3, H, n), (3, n, n), (3, n, 1), (3, n, 1), (3, 1, 1),
                        (3, H, F, F), (3, F, H), (3, H, F), (3, F, hidden), (3, 1, hidden),
                        (hidden, hidden), (1, hidden), (3, hidden, HEAD_PAD), (3, 1, HEAD_PAD)])
    out_bytes = 4 * (3 * HEAD_PAD + 3 * n * n + 3 * hidden + 3 * n * hidden)
    cost = pl.CostEstimate(flops=3 * flops_per_branch,
                           transcendentals=3 * H * n * n,
                           bytes_accessed=in_bytes + out_bytes)

    heads_out, att_out, hg_out, x_out = pl.pallas_call(
        functools.partial(_fused_branches_kernel, num_heads=num_heads),
        grid=(3,),
        in_specs=in_specs,
        out_specs=out_specs,
        out_shape=out_shape,
        compiler_params=pltpu.CompilerParams(
            dimension_semantics=("parallel",),          # v7x: one branch per TensorCore
            vmem_limit_bytes=32 * 1024 * 1024),
        cost_estimate=cost,
    )(h_s, elT_s, adjT_s, ns_s, nd_s, relu_s, fcw_s, wr_s, gb_s,
      caw_s, cab_s, c2w, c2b, hw_s, hb_s)

    # ---- tiny XLA glue (fused under jit): un-pad heads, per-edge gathers, column slice --
    reg1 = heads_out[0, :, :r1]
    reg2 = heads_out[1, :, :r2]
    cls = heads_out[2, :, :nc]
    # att[v, u] = max_h alpha(u -> v); gather per edge in (src, dst) order.
    attention_values = att_out[0][dst1, src1][:, None]                       # (E1, 1)
    attention_reactions = att_out[2][dst3, src3][:, None]                    # (E3, 1)
    weight = x_out[2, :, weight_index]                                       # h3[:, 78]
    hg3 = hg_out[2]                                                          # (1, hidden)

    return (reg1, reg2, cls, attention_values, attention_reactions, weight, hg3)


# ----------------------------------------------------------------------------- setup
def make_graph(key, n, p=0.3):
    a = (jax.random.uniform(key, (n, n)) < p).astype(jnp.float32)
    a = jnp.maximum(a, jnp.eye(n, dtype=jnp.float32))   # self loops (no zero in-degree)
    a_np = np.asarray(a)
    src, dst = np.nonzero(a_np)                          # row-major edge order
    return a, jnp.asarray(src, jnp.int32), jnp.asarray(dst, jnp.int32)


def init_params(key, in_dim, hidden_dim, r1, r2, num_classes, heads=3):
    ks = jax.random.split(key, 20)
    w = lambda k, s: (0.1 * jax.random.normal(k, s)).astype(jnp.float32)
    f1 = in_dim - 1
    p = {}
    # GATConv(in_dim-1, in_dim-1, num_heads=3)
    p["gat1_fc"] = w(ks[0], (f1, heads * f1))           # torch fc.weight.T (no bias)
    p["gat1_al"] = w(ks[1], (heads, f1))
    p["gat1_ar"] = w(ks[2], (heads, f1))
    p["gat1_b"] = w(ks[3], (heads * f1,))
    # GATConv(in_dim, in_dim, num_heads=3)
    p["gat2_fc"] = w(ks[4], (in_dim, heads * in_dim))
    p["gat2_al"] = w(ks[5], (heads, in_dim))
    p["gat2_ar"] = w(ks[6], (heads, in_dim))
    p["gat2_b"] = w(ks[7], (heads * in_dim,))
    # GraphConv weights (stored (in, out))
    p["conv1_w"] = w(ks[8], (in_dim, hidden_dim));      p["conv1_b"] = w(ks[9], (1, hidden_dim))
    p["conv2_w"] = w(ks[10], (hidden_dim, hidden_dim)); p["conv2_b"] = w(ks[11], (1, hidden_dim))
    p["conv3_w"] = w(ks[12], (f1, hidden_dim));         p["conv3_b"] = w(ks[13], (1, hidden_dim))
    # task heads (torch Linear weight.T)
    p["reg1_w"] = w(ks[14], (hidden_dim, r1)); p["reg1_b"] = w(ks[15], (1, r1))
    p["reg2_w"] = w(ks[16], (hidden_dim, r2)); p["reg2_b"] = w(ks[17], (1, r2))
    p["cls_w"] = w(ks[18], (hidden_dim, num_classes)); p["cls_b"] = w(ks[19], (1, num_classes))
    return p


if __name__ == "__main__":
    in_dim = 8
    hidden_dim = 128            # must be > 78 because the forward indexes h3[:, 78]
    reg_dim1, reg_dim2, num_classes = 3, 2, 5
    n1 = n2 = n3 = 16

    key = jax.random.PRNGKey(0)
    kg1, kg2, kg3, kh1, kh2, kh3, kp = jax.random.split(key, 7)

    g1 = make_graph(kg1, n1)
    g2 = make_graph(kg2, n2)
    g3 = make_graph(kg3, n3)

    h1 = jax.random.normal(kh1, (n1, in_dim - 1), dtype=jnp.float32)
    h2 = jax.random.normal(kh2, (n2, in_dim - 1), dtype=jnp.float32)
    h3 = jax.random.normal(kh3, (n3, in_dim), dtype=jnp.float32)

    params = init_params(kp, in_dim, hidden_dim, reg_dim1, reg_dim2, num_classes)

    fwd = jax.jit(functools.partial(multi_task_gnn_forward, in_dim=in_dim))
    outs = jax.block_until_ready(fwd(params, g1, g2, g3, h1, h2, h3))

    (reg1, reg2, cls, att_vals, att_rxn, wcol, hg3) = outs
    assert reg1.shape == (1, reg_dim1)
    assert reg2.shape == (1, reg_dim2)
    assert cls.shape == (1, num_classes)
    assert att_vals.shape == (g1[1].shape[0], 1)
    assert att_rxn.shape == (g3[1].shape[0], 1)
    assert wcol.shape == (n3,)
    assert hg3.shape == (1, hidden_dim)
    assert all(bool(jnp.all(jnp.isfinite(o))) for o in
               (reg1, reg2, cls, att_vals, att_rxn, wcol, hg3))
    print("KERNEL_OK")
</pallas_src>

<mosaic_0001>
module attributes {stable_mosaic.version = 11 : i64} {
  func.func @_fused_branches_kernel(%arg0: i32, %arg1: memref<1x16x8xf32, #tpu.memory_space<vmem>>, %arg2: memref<1x3x16xf32, #tpu.memory_space<vmem>>, %arg3: memref<1x16x16xf32, #tpu.memory_space<vmem>>, %arg4: memref<1x16x1xf32, #tpu.memory_space<vmem>>, %arg5: memref<1x16x1xf32, #tpu.memory_space<vmem>>, %arg6: memref<1x1x1xf32, #tpu.memory_space<vmem>>, %arg7: memref<1x3x8x8xf32, #tpu.memory_space<vmem>>, %arg8: memref<1x8x3xf32, #tpu.memory_space<vmem>>, %arg9: memref<1x3x8xf32, #tpu.memory_space<vmem>>, %arg10: memref<1x8x128xf32, #tpu.memory_space<vmem>>, %arg11: memref<1x1x128xf32, #tpu.memory_space<vmem>>, %arg12: memref<128x128xf32, #tpu.memory_space<vmem>>, %arg13: memref<1x128xf32, #tpu.memory_space<vmem>>, %arg14: memref<1x128x128xf32, #tpu.memory_space<vmem>>, %arg15: memref<1x1x128xf32, #tpu.memory_space<vmem>>, %arg16: memref<1x1x128xf32, #tpu.memory_space<vmem>>, %arg17: memref<1x16x16xf32, #tpu.memory_space<vmem>>, %arg18: memref<1x1x128xf32, #tpu.memory_space<vmem>>, %arg19: memref<1x16x128xf32, #tpu.memory_space<vmem>>) attributes {dimension_semantics = [#tpu.dimension_semantics<parallel>], iteration_bounds = array<i64: 3>, scalar_prefetch = 0 : i64, scratch_operands = 0 : i64, tpu.core_type = #tpu.core_type<tc>, window_params = [{transform_indices = @transform_0, window_bounds = array<i64: 1, 16, 8>}, {transform_indices = @transform_1, window_bounds = array<i64: 1, 3, 16>}, {transform_indices = @transform_2, window_bounds = array<i64: 1, 16, 16>}, {transform_indices = @transform_3, window_bounds = array<i64: 1, 16, 1>}, {transform_indices = @transform_4, window_bounds = array<i64: 1, 16, 1>}, {transform_indices = @transform_5, window_bounds = array<i64: 1, 1, 1>}, {transform_indices = @transform_6, window_bounds = array<i64: 1, 3, 8, 8>}, {transform_indices = @transform_7, window_bounds = array<i64: 1, 8, 3>}, {transform_indices = @transform_8, window_bounds = array<i64: 1, 3, 8>}, {transform_indices = @transform_9, window_bounds = array<i64: 1, 8, 128>}, {transform_indices = @transform_10, window_bounds = array<i64: 1, 1, 128>}, {pipeline_mode = #tpu.pipeline_mode<synchronous>, transform_indices = @transform_11, window_bounds = array<i64: 128, 128>}, {pipeline_mode = #tpu.pipeline_mode<synchronous>, transform_indices = @transform_12, window_bounds = array<i64: 1, 128>}, {transform_indices = @transform_13, window_bounds = array<i64: 1, 128, 128>}, {transform_indices = @transform_14, window_bounds = array<i64: 1, 1, 128>}, {transform_indices = @transform_15, window_bounds = array<i64: 1, 1, 128>}, {transform_indices = @transform_16, window_bounds = array<i64: 1, 16, 16>}, {transform_indices = @transform_17, window_bounds = array<i64: 1, 1, 128>}, {transform_indices = @transform_18, window_bounds = array<i64: 1, 16, 128>}]} {
    %c0 = arith.constant 0 : index
    %c0_0 = arith.constant 0 : index
    %c0_1 = arith.constant 0 : index
    %0 = vector.load %arg1[%c0, %c0_0, %c0_1] : memref<1x16x8xf32, #tpu.memory_space<vmem>>, vector<1x16x8xf32>
    %1 = vector.shape_cast %0 : vector<1x16x8xf32> to vector<16x8xf32>
    %c0_2 = arith.constant 0 : index
    %c0_3 = arith.constant 0 : index
    %c0_4 = arith.constant 0 : index
    %2 = vector.load %arg3[%c0_2, %c0_3, %c0_4] : memref<1x16x16xf32, #tpu.memory_space<vmem>>, vector<1x16x16xf32>
    %3 = vector.shape_cast %2 : vector<1x16x16xf32> to vector<16x16xf32>
    %c0_5 = arith.constant 0 : index
    %c0_6 = arith.constant 0 : index
    %c0_7 = arith.constant 0 : index
    %4 = vector.load %arg4[%c0_5, %c0_6, %c0_7] : memref<1x16x1xf32, #tpu.memory_space<vmem>>, vector<1x16x1xf32>
    %5 = vector.shape_cast %4 : vector<1x16x1xf32> to vector<16x1xf32>
    %c0_8 = arith.constant 0 : index
    %c0_9 = arith.constant 0 : index
    %c0_10 = arith.constant 0 : index
    %6 = vector.load %arg5[%c0_8, %c0_9, %c0_10] : memref<1x16x1xf32, #tpu.memory_space<vmem>>, vector<1x16x1xf32>
    %7 = vector.shape_cast %6 : vector<1x16x1xf32> to vector<16x1xf32>
    %c0_11 = arith.constant 0 : index
    %c0_12 = arith.constant 0 : index
    %c0_13 = arith.constant 0 : index
    %8 = vector.load %arg2[%c0_11, %c0_12, %c0_13] : memref<1x3x16xf32, #tpu.memory_space<vmem>>, vector<1x3x16xf32>
    %9 = vector.shape_cast %8 : vector<1x3x16xf32> to vector<3x16xf32>
    %c0_14 = arith.constant 0 : index
    %c0_15 = arith.constant 0 : index
    %c0_16 = arith.constant 0 : index
    %10 = vector.load %arg9[%c0_14, %c0_15, %c0_16] : memref<1x3x8xf32, #tpu.memory_space<vmem>>, vector<1x3x8xf32>
    %11 = vector.shape_cast %10 : vector<1x3x8xf32> to vector<3x8xf32>
    %c0_17 = arith.constant 0 : index
    %c0_18 = arith.constant 0 : index
    %c0_19 = arith.constant 0 : index
    %12 = vector.load %arg6[%c0_17, %c0_18, %c0_19] : memref<1x1x1xf32, #tpu.memory_space<vmem>>, vector<1x1x1xf32>
    %13 = vector.shape_cast %12 : vector<1x1x1xf32> to vector<1x1xf32>
    %c0_20 = arith.constant 0 : index
    %c0_21 = arith.constant 0 : index
    %c0_22 = arith.constant 0 : index
    %14 = vector.load %arg8[%c0_20, %c0_21, %c0_22] : memref<1x8x3xf32, #tpu.memory_space<vmem>>, vector<1x8x3xf32>
    %15 = vector.shape_cast %14 : vector<1x8x3xf32> to vector<8x3xf32>
    %cst = arith.constant dense<0.000000e+00> : vector<16x3xf32>
    %16 = tpu.matmul %1, %15, %cst {dimension_numbers = #tpu.dot_dimension_numbers<[1], [0], [0], [1], [0, 0, 1, 1], [], []>} : vector<16x8xf32>, vector<8x3xf32>, vector<16x3xf32> -> vector<16x3xf32>
    %c0_23 = arith.constant 0 : index
    %c0_24 = arith.constant 0 : index
    %c0_25 = arith.constant 0 : index
    %c0_26 = arith.constant 0 : index
    %17 = vector.load %arg7[%c0_23, %c0_24, %c0_25, %c0_26] : memref<1x3x8x8xf32, #tpu.memory_space<vmem>>, vector<1x1x8x8xf32>
    %18 = vector.shape_cast %17 : vector<1x1x8x8xf32> to vector<8x8xf32>
    %cst_27 = arith.constant dense<0.000000e+00> : vector<16x8xf32>
    %19 = tpu.matmul %1, %18, %cst_27 {dimension_numbers = #tpu.dot_dimension_numbers<[1], [0], [0], [1], [0, 0, 1, 1], [], []>} : vector<16x8xf32>, vector<8x8xf32>, vector<16x8xf32> -> vector<16x8xf32>
    %20 = vector.extract_strided_slice %16 {offsets = [0, 0], sizes = [16, 1], strides = [1, 1]} : vector<16x3xf32> to vector<16x1xf32>
    %21 = vector.extract_strided_slice %9 {offsets = [0, 0], sizes = [1, 16], strides = [1, 1]} : vector<3x16xf32> to vector<1x16xf32>
    %22 = vector.broadcast %20 : vector<16x1xf32> to vector<16x16xf32>
    %23 = vector.broadcast %21 : vector<1x16xf32> to vector<16x16xf32>
    %24 = arith.addf %22, %23 : vector<16x16xf32>
    %cst_28 = arith.constant 0.000000e+00 : f32
    %25 = vector.broadcast %cst_28 : f32 to vector<16x16xf32>
    %26 = arith.cmpf oge, %24, %25 : vector<16x16xf32>
    %cst_29 = arith.constant 2.000000e-01 : f32
    %27 = vector.broadcast %cst_29 : f32 to vector<16x16xf32>
    %28 = arith.mulf %27, %24 : vector<16x16xf32>
    %29 = arith.select %26, %24, %28 : vector<16x16xi1>, vector<16x16xf32>
    %cst_30 = arith.constant 0.000000e+00 : f32
    %30 = vector.broadcast %cst_30 : f32 to vector<16x16xf32>
    %31 = arith.cmpf ogt, %3, %30 : vector<16x16xf32>
    %cst_31 = arith.constant -1.000000e+30 : f32
    %32 = vector.broadcast %cst_31 : f32 to vector<16x16xf32>
    %33 = arith.select %31, %29, %32 : vector<16x16xi1>, vector<16x16xf32>
    %cst_32 = arith.constant dense<0xFF800000> : vector<16xf32>
    %34 = vector.multi_reduction <maximumf>, %33, %cst_32 [1] : vector<16x16xf32> to vector<16xf32>
    %35 = vector.shape_cast %34 : vector<16xf32> to vector<16x1xf32>
    %36 = vector.broadcast %35 : vector<16x1xf32> to vector<16x16xf32>
    %37 = arith.subf %33, %36 : vector<16x16xf32>
    %38 = math.exp %37 : vector<16x16xf32>
    %cst_33 = arith.constant dense<0.000000e+00> : vector<16xf32>
    %39 = vector.multi_reduction <add>, %38, %cst_33 [1] : vector<16x16xf32> to vector<16xf32>
    %40 = vector.shape_cast %39 : vector<16xf32> to vector<16x1xf32>
    %cst_34 = arith.constant 1.000000e-30 : f32
    %41 = vector.broadcast %cst_34 : f32 to vector<16x1xf32>
    %42 = arith.maximumf %40, %41 : vector<16x1xf32>
    %43 = vector.broadcast %42 : vector<16x1xf32> to vector<16x16xf32>
    %44 = arith.divf %38, %43 : vector<16x16xf32>
    %45 = arith.truncf %44 : vector<16x16xf32> to vector<16x16xbf16>
    %46 = arith.truncf %19 : vector<16x8xf32> to vector<16x8xbf16>
    %cst_35 = arith.constant dense<0.000000e+00> : vector<16x8xf32>
    %47 = tpu.matmul %45, %46, %cst_35 {dimension_numbers = #tpu.dot_dimension_numbers<[1], [0], [0], [1], [0, 0, 1, 1], [], []>} : vector<16x16xbf16>, vector<16x8xbf16>, vector<16x8xf32> -> vector<16x8xf32>
    %48 = vector.extract_strided_slice %11 {offsets = [0, 0], sizes = [1, 8], strides = [1, 1]} : vector<3x8xf32> to vector<1x8xf32>
    %49 = vector.broadcast %48 : vector<1x8xf32> to vector<16x8xf32>
    %50 = arith.addf %47, %49 : vector<16x8xf32>
    %c0_36 = arith.constant 0 : index
    %c1 = arith.constant 1 : index
    %c0_37 = arith.constant 0 : index
    %c0_38 = arith.constant 0 : index
    %51 = vector.load %arg7[%c0_36, %c1, %c0_37, %c0_38] : memref<1x3x8x8xf32, #tpu.memory_space<vmem>>, vector<1x1x8x8xf32>
    %52 = vector.shape_cast %51 : vector<1x1x8x8xf32> to vector<8x8xf32>
    %cst_39 = arith.constant dense<0.000000e+00> : vector<16x8xf32>
    %53 = tpu.matmul %1, %52, %cst_39 {dimension_numbers = #tpu.dot_dimension_numbers<[1], [0], [0], [1], [0, 0, 1, 1], [], []>} : vector<16x8xf32>, vector<8x8xf32>, vector<16x8xf32> -> vector<16x8xf32>
    %54 = vector.extract_strided_slice %16 {offsets = [0, 1], sizes = [16, 1], strides = [1, 1]} : vector<16x3xf32> to vector<16x1xf32>
    %55 = vector.extract_strided_slice %9 {offsets = [1, 0], sizes = [1, 16], strides = [1, 1]} : vector<3x16xf32> to vector<1x16xf32>
    %56 = vector.broadcast %54 : vector<16x1xf32> to vector<16x16xf32>
    %57 = vector.broadcast %55 : vector<1x16xf32> to vector<16x16xf32>
    %58 = arith.addf %56, %57 : vector<16x16xf32>
    %cst_40 = arith.constant 0.000000e+00 : f32
    %59 = vector.broadcast %cst_40 : f32 to vector<16x16xf32>
    %60 = arith.cmpf oge, %58, %59 : vector<16x16xf32>
    %cst_41 = arith.constant 2.000000e-01 : f32
    %61 = vector.broadcast %cst_41 : f32 to vector<16x16xf32>
    %62 = arith.mulf %61, %58 : vector<16x16xf32>
    %63 = arith.select %60, %58, %62 : vector<16x16xi1>, vector<16x16xf32>
    %cst_42 = arith.constant 0.000000e+00 : f32
    %64 = vector.broadcast %cst_42 : f32 to vector<16x16xf32>
    %65 = arith.cmpf ogt, %3, %64 : vector<16x16xf32>
    %cst_43 = arith.constant -1.000000e+30 : f32
    %66 = vector.broadcast %cst_43 : f32 to vector<16x16xf32>
    %67 = arith.select %65, %63, %66 : vector<16x16xi1>, vector<16x16xf32>
    %cst_44 = arith.constant dense<0xFF800000> : vector<16xf32>
    %68 = vector.multi_reduction <maximumf>, %67, %cst_44 [1] : vector<16x16xf32> to vector<16xf32>
    %69 = vector.shape_cast %68 : vector<16xf32> to vector<16x1xf32>
    %70 = vector.broadcast %69 : vector<16x1xf32> to vector<16x16xf32>
    %71 = arith.subf %67, %70 : vector<16x16xf32>
    %72 = math.exp %71 : vector<16x16xf32>
    %cst_45 = arith.constant dense<0.000000e+00> : vector<16xf32>
    %73 = vector.multi_reduction <add>, %72, %cst_45 [1] : vector<16x16xf32> to vector<16xf32>
    %74 = vector.shape_cast %73 : vector<16xf32> to vector<16x1xf32>
    %cst_46 = arith.constant 1.000000e-30 : f32
    %75 = vector.broadcast %cst_46 : f32 to vector<16x1xf32>
    %76 = arith.maximumf %74, %75 : vector<16x1xf32>
    %77 = vector.broadcast %76 : vector<16x1xf32> to vector<16x16xf32>
    %78 = arith.divf %72, %77 : vector<16x16xf32>
    %79 = arith.truncf %78 : vector<16x16xf32> to vector<16x16xbf16>
    %80 = arith.truncf %53 : vector<16x8xf32> to vector<16x8xbf16>
    %cst_47 = arith.constant dense<0.000000e+00> : vector<16x8xf32>
    %81 = tpu.matmul %79, %80, %cst_47 {dimension_numbers = #tpu.dot_dimension_numbers<[1], [0], [0], [1], [0, 0, 1, 1], [], []>} : vector<16x16xbf16>, vector<16x8xbf16>, vector<16x8xf32> -> vector<16x8xf32>
    %82 = vector.extract_strided_slice %11 {offsets = [1, 0], sizes = [1, 8], strides = [1, 1]} : vector<3x8xf32> to vector<1x8xf32>
    %83 = vector.broadcast %82 : vector<1x8xf32> to vector<16x8xf32>
    %84 = arith.addf %81, %83 : vector<16x8xf32>
    %85 = arith.maximumf %50, %84 : vector<16x8xf32>
    %86 = arith.maximumf %44, %78 : vector<16x16xf32>
    %c0_48 = arith.constant 0 : index
    %c2 = arith.constant 2 : index
    %c0_49 = arith.constant 0 : index
    %c0_50 = arith.constant 0 : index
    %87 = vector.load %arg7[%c0_48, %c2, %c0_49, %c0_50] : memref<1x3x8x8xf32, #tpu.memory_space<vmem>>, vector<1x1x8x8xf32>
    %88 = vector.shape_cast %87 : vector<1x1x8x8xf32> to vector<8x8xf32>
    %cst_51 = arith.constant dense<0.000000e+00> : vector<16x8xf32>
    %89 = tpu.matmul %1, %88, %cst_51 {dimension_numbers = #tpu.dot_dimension_numbers<[1], [0], [0], [1], [0, 0, 1, 1], [], []>} : vector<16x8xf32>, vector<8x8xf32>, vector<16x8xf32> -> vector<16x8xf32>
    %90 = vector.extract_strided_slice %16 {offsets = [0, 2], sizes = [16, 1], strides = [1, 1]} : vector<16x3xf32> to vector<16x1xf32>
    %91 = vector.extract_strided_slice %9 {offsets = [2, 0], sizes = [1, 16], strides = [1, 1]} : vector<3x16xf32> to vector<1x16xf32>
    %92 = vector.broadcast %90 : vector<16x1xf32> to vector<16x16xf32>
    %93 = vector.broadcast %91 : vector<1x16xf32> to vector<16x16xf32>
    %94 = arith.addf %92, %93 : vector<16x16xf32>
    %cst_52 = arith.constant 0.000000e+00 : f32
    %95 = vector.broadcast %cst_52 : f32 to vector<16x16xf32>
    %96 = arith.cmpf oge, %94, %95 : vector<16x16xf32>
    %cst_53 = arith.constant 2.000000e-01 : f32
    %97 = vector.broadcast %cst_53 : f32 to vector<16x16xf32>
    %98 = arith.mulf %97, %94 : vector<16x16xf32>
    %99 = arith.select %96, %94, %98 : vector<16x16xi1>, vector<16x16xf32>
    %cst_54 = arith.constant 0.000000e+00 : f32
    %100 = vector.broadcast %cst_54 : f32 to vector<16x16xf32>
    %101 = arith.cmpf ogt, %3, %100 : vector<16x16xf32>
    %cst_55 = arith.constant -1.000000e+30 : f32
    %102 = vector.broadcast %cst_55 : f32 to vector<16x16xf32>
    %103 = arith.select %101, %99, %102 : vector<16x16xi1>, vector<16x16xf32>
    %cst_56 = arith.constant dense<0xFF800000> : vector<16xf32>
    %104 = vector.multi_reduction <maximumf>, %103, %cst_56 [1] : vector<16x16xf32> to vector<16xf32>
    %105 = vector.shape_cast %104 : vector<16xf32> to vector<16x1xf32>
    %106 = vector.broadcast %105 : vector<16x1xf32> to vector<16x16xf32>
    %107 = arith.subf %103, %106 : vector<16x16xf32>
    %108 = math.exp %107 : vector<16x16xf32>
    %cst_57 = arith.constant dense<0.000000e+00> : vector<16xf32>
    %109 = vector.multi_reduction <add>, %108, %cst_57 [1] : vector<16x16xf32> to vector<16xf32>
    %110 = vector.shape_cast %109 : vector<16xf32> to vector<16x1xf32>
    %cst_58 = arith.constant 1.000000e-30 : f32
    %111 = vector.broadcast %cst_58 : f32 to vector<16x1xf32>
    %112 = arith.maximumf %110, %111 : vector<16x1xf32>
    %113 = vector.broadcast %112 : vector<16x1xf32> to vector<16x16xf32>
    %114 = arith.divf %108, %113 : vector<16x16xf32>
    %115 = arith.truncf %114 : vector<16x16xf32> to vector<16x16xbf16>
    %116 = arith.truncf %89 : vector<16x8xf32> to vector<16x8xbf16>
    %cst_59 = arith.constant dense<0.000000e+00> : vector<16x8xf32>
    %117 = tpu.matmul %115, %116, %cst_59 {dimension_numbers = #tpu.dot_dimension_numbers<[1], [0], [0], [1], [0, 0, 1, 1], [], []>} : vector<16x16xbf16>, vector<16x8xbf16>, vector<16x8xf32> -> vector<16x8xf32>
    %118 = vector.extract_strided_slice %11 {offsets = [2, 0], sizes = [1, 8], strides = [1, 1]} : vector<3x8xf32> to vector<1x8xf32>
    %119 = vector.broadcast %118 : vector<1x8xf32> to vector<16x8xf32>
    %120 = arith.addf %117, %119 : vector<16x8xf32>
    %121 = arith.maximumf %85, %120 : vector<16x8xf32>
    %122 = arith.maximumf %86, %114 : vector<16x16xf32>
    %c0_60 = arith.constant 0 : index
    %c0_61 = arith.constant 0 : index
    %c0_62 = arith.constant 0 : index
    %123 = vector.load %arg17[%c0_60, %c0_61, %c0_62] : memref<1x16x16xf32, #tpu.memory_space<vmem>>, vector<1x16x16xf32>
    %124 = vector.shape_cast %123 : vector<1x16x16xf32> to vector<16x16xf32>
    %125 = vector.shape_cast %122 : vector<16x16xf32> to vector<1x16x16xf32>
    tpu.vector_store %arg17[%c0_60, %c0_61, %c0_62], %125 {strides = array<i32>} : memref<1x16x16xf32, #tpu.memory_space<vmem>>, vector<1x16x16xf32>,
    %cst_63 = arith.constant 0.000000e+00 : f32
    %126 = vector.broadcast %cst_63 : f32 to vector<16x8xf32>
    %127 = arith.maximumf %121, %126 : vector<16x8xf32>
    %128 = vector.broadcast %13 : vector<1x1xf32> to vector<16x8xf32>
    %129 = arith.mulf %128, %127 : vector<16x8xf32>
    %cst_64 = arith.constant 1.000000e+00 : f32
    %130 = vector.broadcast %cst_64 : f32 to vector<1x1xf32>
    %131 = arith.subf %130, %13 : vector<1x1xf32>
    %132 = vector.broadcast %131 : vector<1x1xf32> to vector<16x8xf32>
    %133 = arith.mulf %132, %121 : vector<16x8xf32>
    %134 = arith.addf %129, %133 : vector<16x8xf32>
    %135 = arith.truncf %3 : vector<16x16xf32> to vector<16x16xbf16>
    %c0_65 = arith.constant 0 : index
    %c0_66 = arith.constant 0 : index
    %c0_67 = arith.constant 0 : index
    %136 = vector.load %arg10[%c0_65, %c0_66, %c0_67] : memref<1x8x128xf32, #tpu.memory_space<vmem>>, vector<1x8x128xf32>
    %137 = vector.shape_cast %136 : vector<1x8x128xf32> to vector<8x128xf32>
    %c0_68 = arith.constant 0 : index
    %c0_69 = arith.constant 0 : index
    %c0_70 = arith.constant 0 : index
    %138 = vector.load %arg11[%c0_68, %c0_69, %c0_70] : memref<1x1x128xf32, #tpu.memory_space<vmem>>, vector<1x1x128xf32>
    %139 = vector.shape_cast %138 : vector<1x1x128xf32> to vector<1x128xf32>
    %140 = vector.broadcast %5 : vector<16x1xf32> to vector<16x8xf32>
    %141 = arith.mulf %134, %140 : vector<16x8xf32>
    %142 = arith.truncf %141 : vector<16x8xf32> to vector<16x8xbf16>
    %cst_71 = arith.constant dense<0.000000e+00> : vector<16x8xf32>
    %143 = tpu.matmul %135, %142, %cst_71 {dimension_numbers = #tpu.dot_dimension_numbers<[1], [0], [0], [1], [0, 0, 1, 1], [], []>} : vector<16x16xbf16>, vector<16x8xbf16>, vector<16x8xf32> -> vector<16x8xf32>
    %144 = vector.broadcast %7 : vector<16x1xf32> to vector<16x8xf32>
    %145 = arith.mulf %143, %144 : vector<16x8xf32>
    %146 = arith.truncf %145 : vector<16x8xf32> to vector<16x8xbf16>
    %147 = arith.truncf %137 : vector<8x128xf32> to vector<8x128xbf16>
    %cst_72 = arith.constant dense<0.000000e+00> : vector<16x128xf32>
    %148 = tpu.matmul %146, %147, %cst_72 {dimension_numbers = #tpu.dot_dimension_numbers<[1], [0], [0], [1], [0, 0, 1, 1], [], []>} : vector<16x8xbf16>, vector<8x128xbf16>, vector<16x128xf32> -> vector<16x128xf32>
    %149 = vector.broadcast %139 : vector<1x128xf32> to vector<16x128xf32>
    %150 = arith.addf %148, %149 : vector<16x128xf32>
    %cst_73 = arith.constant 0.000000e+00 : f32
    %151 = vector.broadcast %cst_73 : f32 to vector<16x128xf32>
    %152 = arith.maximumf %150, %151 : vector<16x128xf32>
    %c0_74 = arith.constant 0 : index
    %c0_75 = arith.constant 0 : index
    %153 = vector.load %arg12[%c0_74, %c0_75] : memref<128x128xf32, #tpu.memory_space<vmem>>, vector<128x128xf32>
    %c0_76 = arith.constant 0 : index
    %c0_77 = arith.constant 0 : index
    %154 = vector.load %arg13[%c0_76, %c0_77] : memref<1x128xf32, #tpu.memory_space<vmem>>, vector<1x128xf32>
    %155 = vector.broadcast %5 : vector<16x1xf32> to vector<16x128xf32>
    %156 = arith.mulf %152, %155 : vector<16x128xf32>
    %157 = arith.truncf %156 : vector<16x128xf32> to vector<16x128xbf16>
    %cst_78 = arith.constant dense<0.000000e+00> : vector<16x128xf32>
    %158 = tpu.matmul %135, %157, %cst_78 {dimension_numbers = #tpu.dot_dimension_numbers<[1], [0], [0], [1], [0, 0, 1, 1], [], []>} : vector<16x16xbf16>, vector<16x128xbf16>, vector<16x128xf32> -> vector<16x128xf32>
    %159 = vector.broadcast %7 : vector<16x1xf32> to vector<16x128xf32>
    %160 = arith.mulf %158, %159 : vector<16x128xf32>
    %161 = arith.truncf %160 : vector<16x128xf32> to vector<16x128xbf16>
    %162 = arith.truncf %153 : vector<128x128xf32> to vector<128x128xbf16>
    %cst_79 = arith.constant dense<0.000000e+00> : vector<16x128xf32>
    %163 = tpu.matmul %161, %162, %cst_79 {dimension_numbers = #tpu.dot_dimension_numbers<[1], [0], [0], [1], [0, 0, 1, 1], [], []>} : vector<16x128xbf16>, vector<128x128xbf16>, vector<16x128xf32> -> vector<16x128xf32>
    %164 = vector.broadcast %154 : vector<1x128xf32> to vector<16x128xf32>
    %165 = arith.addf %163, %164 : vector<16x128xf32>
    %cst_80 = arith.constant 0.000000e+00 : f32
    %166 = vector.broadcast %cst_80 : f32 to vector<16x128xf32>
    %167 = arith.maximumf %165, %166 : vector<16x128xf32>
    %c0_81 = arith.constant 0 : index
    %c0_82 = arith.constant 0 : index
    %c0_83 = arith.constant 0 : index
    %168 = vector.load %arg19[%c0_81, %c0_82, %c0_83] : memref<1x16x128xf32, #tpu.memory_space<vmem>>, vector<1x16x128xf32>
    %169 = vector.shape_cast %168 : vector<1x16x128xf32> to vector<16x128xf32>
    %170 = vector.shape_cast %167 : vector<16x128xf32> to vector<1x16x128xf32>
    tpu.vector_store %arg19[%c0_81, %c0_82, %c0_83], %170 {strides = array<i32>} : memref<1x16x128xf32, #tpu.memory_space<vmem>>, vector<1x16x128xf32>,
    %cst_84 = arith.constant dense<0.000000e+00> : vector<128xf32>
    %171 = vector.multi_reduction <add>, %167, %cst_84 [0] : vector<16x128xf32> to vector<128xf32>
    %172 = vector.shape_cast %171 : vector<128xf32> to vector<1x128xf32>
    %cst_85 = arith.constant 1.600000e+01 : f32
    %173 = vector.broadcast %cst_85 : f32 to vector<1x128xf32>
    %174 = arith.divf %172, %173 : vector<1x128xf32>
    %c0_86 = arith.constant 0 : index
    %c0_87 = arith.constant 0 : index
    %c0_88 = arith.constant 0 : index
    %175 = vector.load %arg18[%c0_86, %c0_87, %c0_88] : memref<1x1x128xf32, #tpu.memory_space<vmem>>, vector<1x1x128xf32>
    %176 = vector.shape_cast %175 : vector<1x1x128xf32> to vector<1x128xf32>
    %177 = vector.shape_cast %174 : vector<1x128xf32> to vector<1x1x128xf32>
    tpu.vector_store %arg18[%c0_86, %c0_87, %c0_88], %177 {strides = array<i32>} : memref<1x1x128xf32, #tpu.memory_space<vmem>>, vector<1x1x128xf32>,
    %c0_89 = arith.constant 0 : index
    %c0_90 = arith.constant 0 : index
    %c0_91 = arith.constant 0 : index
    %178 = vector.load %arg14[%c0_89, %c0_90, %c0_91] : memref<1x128x128xf32, #tpu.memory_space<vmem>>, vector<1x128x128xf32>
    %179 = vector.shape_cast %178 : vector<1x128x128xf32> to vector<128x128xf32>
    %cst_92 = arith.constant dense<0.000000e+00> : vector<1x128xf32>
    %180 = tpu.matmul %174, %179, %cst_92 {dimension_numbers = #tpu.dot_dimension_numbers<[1], [0], [0], [1], [0, 0, 1, 1], [], []>} : vector<1x128xf32>, vector<128x128xf32>, vector<1x128xf32> -> vector<1x128xf32>
    %c0_93 = arith.constant 0 : index
    %c0_94 = arith.constant 0 : index
    %c0_95 = arith.constant 0 : index
    %181 = vector.load %arg15[%c0_93, %c0_94, %c0_95] : memref<1x1x128xf32, #tpu.memory_space<vmem>>, vector<1x1x128xf32>
    %182 = vector.shape_cast %181 : vector<1x1x128xf32> to vector<1x128xf32>
    %183 = arith.addf %180, %182 : vector<1x128xf32>
    %c0_96 = arith.constant 0 : index
    %c0_97 = arith.constant 0 : index
    %c0_98 = arith.constant 0 : index
    %184 = vector.load %arg16[%c0_96, %c0_97, %c0_98] : memref<1x1x128xf32, #tpu.memory_space<vmem>>, vector<1x1x128xf32>
    %185 = vector.shape_cast %184 : vector<1x1x128xf32> to vector<1x128xf32>
    %186 = vector.shape_cast %183 : vector<1x128xf32> to vector<1x1x128xf32>
    tpu.vector_store %arg16[%c0_96, %c0_97, %c0_98], %186 {strides = array<i32>} : memref<1x1x128xf32, #tpu.memory_space<vmem>>, vector<1x1x128xf32>,
    return
  }
  func.func @transform_0(%arg0: i32) -> (i32, i32, i32) {
    %c0_i32 = arith.constant 0 : i32
    %c0_i32_0 = arith.constant 0 : i32
    %c0_i32_1 = arith.constant 0 : i32
    return %arg0, %c0_i32, %c0_i32_0 : i32, i32, i32
  }
  func.func @transform_1(%arg0: i32) -> (i32, i32, i32) {
    %c0_i32 = arith.constant 0 : i32
    %c0_i32_0 = arith.constant 0 : i32
    %c0_i32_1 = arith.constant 0 : i32
    return %arg0, %c0_i32, %c0_i32_0 : i32, i32, i32
  }
  func.func @transform_2(%arg0: i32) -> (i32, i32, i32) {
    %c0_i32 = arith.constant 0 : i32
    %c0_i32_0 = arith.constant 0 : i32
    %c0_i32_1 = arith.constant 0 : i32
    return %arg0, %c0_i32, %c0_i32_0 : i32, i32, i32
  }
  func.func @transform_3(%arg0: i32) -> (i32, i32, i32) {
    %c0_i32 = arith.constant 0 : i32
    %c0_i32_0 = arith.constant 0 : i32
    %c0_i32_1 = arith.constant 0 : i32
    return %arg0, %c0_i32, %c0_i32_0 : i32, i32, i32
  }
  func.func @transform_4(%arg0: i32) -> (i32, i32, i32) {
    %c0_i32 = arith.constant 0 : i32
    %c0_i32_0 = arith.constant 0 : i32
    %c0_i32_1 = arith.constant 0 : i32
    return %arg0, %c0_i32, %c0_i32_0 : i32, i32, i32
  }
  func.func @transform_5(%arg0: i32) -> (i32, i32, i32) {
    %c0_i32 = arith.constant 0 : i32
    %c0_i32_0 = arith.constant 0 : i32
    %c0_i32_1 = arith.constant 0 : i32
    return %arg0, %c0_i32, %c0_i32_0 : i32, i32, i32
  }
  func.func @transform_6(%arg0: i32) -> (i32, i32, i32, i32) {
    %c0_i32 = arith.constant 0 : i32
    %c0_i32_0 = arith.constant 0 : i32
    %c0_i32_1 = arith.constant 0 : i32
    %c0_i32_2 = arith.constant 0 : i32
    return %arg0, %c0_i32, %c0_i32_0, %c0_i32_1 : i32, i32, i32, i32
  }
  func.func @transform_7(%arg0: i32) -> (i32, i32, i32) {
    %c0_i32 = arith.constant 0 : i32
    %c0_i32_0 = arith.constant 0 : i32
    %c0_i32_1 = arith.constant 0 : i32
    return %arg0, %c0_i32, %c0_i32_0 : i32, i32, i32
  }
  func.func @transform_8(%arg0: i32) -> (i32, i32, i32) {
    %c0_i32 = arith.constant 0 : i32
    %c0_i32_0 = arith.constant 0 : i32
    %c0_i32_1 = arith.constant 0 : i32
    return %arg0, %c0_i32, %c0_i32_0 : i32, i32, i32
  }
  func.func @transform_9(%arg0: i32) -> (i32, i32, i32) {
    %c0_i32 = arith.constant 0 : i32
    %c0_i32_0 = arith.constant 0 : i32
    %c0_i32_1 = arith.constant 0 : i32
    return %arg0, %c0_i32, %c0_i32_0 : i32, i32, i32
  }
  func.func @transform_10(%arg0: i32) -> (i32, i32, i32) {
    %c0_i32 = arith.constant 0 : i32
    %c0_i32_0 = arith.constant 0 : i32
    %c0_i32_1 = arith.constant 0 : i32
    return %arg0, %c0_i32, %c0_i32_0 : i32, i32, i32
  }
  func.func @transform_11(%arg0: i32) -> (i32, i32) {
    %c0_i32 = arith.constant 0 : i32
    %c0_i32_0 = arith.constant 0 : i32
    %c0_i32_1 = arith.constant 0 : i32
    return %c0_i32, %c0_i32_0 : i32, i32
  }
  func.func @transform_12(%arg0: i32) -> (i32, i32) {
    %c0_i32 = arith.constant 0 : i32
    %c0_i32_0 = arith.constant 0 : i32
    %c0_i32_1 = arith.constant 0 : i32
    return %c0_i32, %c0_i32_0 : i32, i32
  }
  func.func @transform_13(%arg0: i32) -> (i32, i32, i32) {
    %c0_i32 = arith.constant 0 : i32
    %c0_i32_0 = arith.constant 0 : i32
    %c0_i32_1 = arith.constant 0 : i32
    return %arg0, %c0_i32, %c0_i32_0 : i32, i32, i32
  }
  func.func @transform_14(%arg0: i32) -> (i32, i32, i32) {
    %c0_i32 = arith.constant 0 : i32
    %c0_i32_0 = arith.constant 0 : i32
    %c0_i32_1 = arith.constant 0 : i32
    return %arg0, %c0_i32, %c0_i32_0 : i32, i32, i32
  }
  func.func @transform_15(%arg0: i32) -> (i32, i32, i32) {
    %c0_i32 = arith.constant 0 : i32
    %c0_i32_0 = arith.constant 0 : i32
    %c0_i32_1 = arith.constant 0 : i32
    return %arg0, %c0_i32, %c0_i32_0 : i32, i32, i32
  }
  func.func @transform_16(%arg0: i32) -> (i32, i32, i32) {
    %c0_i32 = arith.constant 0 : i32
    %c0_i32_0 = arith.constant 0 : i32
    %c0_i32_1 = arith.constant 0 : i32
    return %arg0, %c0_i32, %c0_i32_0 : i32, i32, i32
  }
  func.func @transform_17(%arg0: i32) -> (i32, i32, i32) {
    %c0_i32 = arith.constant 0 : i32
    %c0_i32_0 = arith.constant 0 : i32
    %c0_i32_1 = arith.constant 0 : i32
    return %arg0, %c0_i32, %c0_i32_0 : i32, i32, i32
  }
  func.func @transform_18(%arg0: i32) -> (i32, i32, i32) {
    %c0_i32 = arith.constant 0 : i32
    %c0_i32_0 = arith.constant 0 : i32
    %c0_i32_1 = arith.constant 0 : i32
    return %arg0, %c0_i32, %c0_i32_0 : i32, i32, i32
  }
}

</mosaic_0001>

<bundles_post_ra>
// kernel: multi_task_gnn_forward.1
= control target key start
LH: loop header
LB: loop body
LE: loop exit
PB: predicated region body
PF: predicated region fallthrough
CT: control target
= control target key end

     0   :  { %s1904_s27 = smov 0   ;;  %s2239_s0 = inlined_call_operand.vmem [shape: f32[3,16,8], index: 0, kind: input, shape index: {}]   ;;  %s2240_s1 = inlined_call_operand.vmem [shape: f32[3,3,16], index: 1, kind: input, shape index: {}]   ;;  %s2241_s2 = inlined_call_operand.vmem [shape: f32[3,16,16], index: 2, kind: input, shape index: {}]   ;;  %s2242_s3 = inlined_call_operand.vmem [shape: f32[3,16,1], index: 3, kind: input, shape index: {}]   ;;  %s2243_s4 = inlined_call_operand.vmem [shape: f32[3,16,1], index: 4, kind: input, shape index: {}]   ;;  %s2244_s5 = inlined_call_operand.vmem [shape: f32[3,1,1], index: 5, kind: input, shape index: {}]   ;;  %s2245_s6 = inlined_call_operand.vmem [shape: f32[3,3,8,8], index: 6, kind: input, shape index: {}]   ;;  %s2246_s7 = inlined_call_operand.vmem [shape: f32[3,8,3], index: 7, kind: input, shape index: {}]   ;;  %s2247_s8 = inlined_call_operand.vmem [shape: f32[3,3,8], index: 8, kind: input, shape index: {}]   ;;  %s2248_s9 = inlined_call_operand.vmem [shape: f32[3,8,128], index: 9, kind: input, shape index: {}]   ;;  %s2249_s10 = inlined_call_operand.vmem [shape: f32[3,1,128], index: 10, kind: input, shape index: {}]   ;;  %s2250_s11 = inlined_call_operand.vmem [shape: f32[128,128], index: 11, kind: input, shape index: {}]   ;;  %s2251_s12 = inlined_call_operand.vmem [shape: f32[1,128], index: 12, kind: input, shape index: {}]   ;;  %s2252_s13 = inlined_call_operand.vmem [shape: f32[3,128,128], index: 13, kind: input, shape index: {}]   ;;  %s2253_s14 = inlined_call_operand.vmem [shape: f32[3,1,128], index: 14, kind: input, shape index: {}]   ;;  %s2254_s15 = inlined_call_operand.vmem [shape: f32[3,1,128], index: 15, kind: output, shape index: {0}]   ;;  %s2255_s16 = inlined_call_operand.vmem [shape: f32[3,16,16], index: 16, kind: output, shape index: {1}]   ;;  %s2256_s17 = inlined_call_operand.vmem [shape: f32[3,1,128], index: 17, kind: output, shape index: {2}]   ;;  %s2257_s18 = inlined_call_operand.vmem [shape: f32[3,16,128], index: 18, kind: output, shape index: {3}]  }
   0x1   :  { %2259 = sst [smem:[#allocation2_spill]] %s2239_s0 }
   0x2   :  { %2260 = sst [smem:[#allocation3_spill]] %s2240_s1 }
   0x3   :  { %2261 = sst [smem:[#allocation4_spill]] %s2241_s2 }
   0x4 LB: > { %s1701_s28 = sadd.s32 4294967295, %s1803_s27   ;;  %p1705_p0 = scmp.ge.s32.totalorder %s1803_s27, 1  ;;  %s1803_s27 = sphi %s1904_s27, %s29_s27  }
   0x5   : > { %p629_p1 = scmp.lt.s32.totalorder %s1803_s27, 4 }
   0x7   : > { %p630_p2 = pnand %p1705_p0, %p629_p1 }
   0x8   : > { %p744_p3 = scmp.lt.s32.totalorder (!%p630_p2), %s1701_s28, 2  ;;  %s2262_s22 = sld [smem:[#allocation2_spill]] (!%p630_p2) }
   0x9   : > { %633 = sbr.rel (%p630_p2) target bundleno = 1427 (0x593), region = 80  ;;  %s2263_s25 = sld [smem:[#allocation4_spill]] (!%p630_p2) }
   0xe   : > { %v1805_v0 = vmov 2   ;;  %v1806_v1 = vmov 1   ;;  %s2277_s28 = smov (!%p744_p3, %s1701_s28), 2  ;;  %v1807_v2 = vmov 0   ;;  %vm828_vm0 = vcmask 64512  }
   0xf   : > { %1765 = vset.pattern.permute.xlu1 %v1805_v0  ;;  %1766 = vset.pattern.permute.xlu2 %v1806_v1  ;;  %s2258_s29 = sshll.u32 %s2277_s28, 3  ;;  %s1916_s30 = sshll.u32 %s2277_s28, 4  ;;  %vm905_vm4 = vcmask 130048  }
  0x10   : > { %1764 = vset.pattern.permute.xlu0 %v1807_v2  ;;  %s779_s1 = scalar_lea.vmem %s2246_s7, %s2258_s29  ;;  %s748_s2 = scalar_lea.vmem %s2262_s22, %s1916_s30 }
  0x11   : > { %v827_v3 = vld [vmem:[%s779_s1] sm:$0xff]  ;;  %v1931_v5 = vld [vmem:[%s748_s2 + $0x8] sm:$0xff]  ;;  %s757_s26 = scalar_lea.vmem %s2263_s25, %s1916_s30  ;;  %s1751_s0 = smul.u32 24, %s2277_s28 }
  0x12   : > { %850 = vmatpush.msra.mxu0 %v827_v3  ;;  %v1927_v4 = vld [vmem:[%s748_s2] sm:$0xff]  ;;  %v1939_v9 = vld [vmem:[%s757_s26 + $0x8] sm:$0xff]  ;;  %s1708_s19 = sshll.u32 %s2277_s28, 2  ;;  %s2264_s29 = sld [smem:[#allocation3_spill]] }
  0x13   : > { %1725 = vmatmul.msk.f32.vlgmr.msra.gmra.mxu0 %vm828_vm0, %v1927_v4  ;;  %v818_v8 = vld [vmem:[%s757_s26] sm:$0xff]  ;;  %s1949_s21 = scalar_lea.vmem %s2245_s6, %s1751_s0  ;;  %vm902_vm8 = vcmp.gt.f32.partialorder %v1939_v9, 0.0  ;;  %s770_s25 = scalar_lea.vmem %s2244_s5, %s2277_s28 }
  0x14   : > { %v1942_v10 = vpack.c.bf16 %v1939_v9, %v818_v8  ;;  %v858_v11 = vld [vmem:[%s1949_s21] sm:$0xff]  ;;  %vm901_vm3 = vcmp.gt.f32.partialorder %v818_v8, 0.0  ;;  %v1734_v52 = vld [vmem:[%s1949_s21 + $0x10] sm:$0xff]  ;;  %v1730_v53 = vld [vmem:[%s1949_s21 + $0x8] sm:$0xff]  ;;  %s2013_s1 = scalar_lea.vmem %s2242_s3, %s1916_s30  ;;  %s2038_s22 = scalar_lea.vmem %s2243_s4, %s1916_s30 }
  0x15   : > { %874 = vmatpush.msra.mxu1 %v858_v11  ;;  %1750 = vmatpush.msra.mxu3 %v1730_v53  ;;  %s783_s26 = scalar_lea.vmem %s2247_s8, %s1708_s19  ;;  %s2275_s20 = sshll.u32 %s2277_s28, 3 }
  0x16   : > { %1727 = vmatmul.msk.f32.vlgmr.msra.gmra.mxu1 %vm828_vm0, %v1927_v4  ;;  %993 = vmatpush.msrb.mxu0 %v1730_v53  ;;  %s787_s2 = scalar_lea.vmem %s2248_s9, %s2275_s20  ;;  %s1747_s20 = sshll.u32 %s2277_s28, 7 }
  0x17   : > { %1111 = vmatpush.msrb.mxu1 %v1734_v52  ;;  %1732 = vmatmul.msk.f32.vlgmr.msra.gmra.mxu3 %vm828_vm0, %v1931_v5  ;;  %s2199_s24 = scalar_lea.vmem %s2252_s13, %s1747_s20  ;;  %s814_s20 = scalar_lea.vmem %s2257_s18, %s1916_s30 }
  0x18   : > { %s752_s23 = scalar_lea.vmem %s2264_s29, %s1708_s19  ;;  %s806_s29 = scalar_lea.vmem %s2255_s16, %s1916_s30 }
  0x19   : > { %v824_v12 = vld [vmem:[%s752_s23] sm:$0x7] }
  0x1a   : > { %v1127_v14 = vperm.slane %v824_v12, 2  ;;  %v1009_v15 = vperm.slane %v824_v12, 1  ;;  %v892_v16 = vperm.slane %v824_v12, 0 }
  0x1b   : > { %1726 = vmatmul.msk.f32.gmra.mxu0 %vm828_vm0, %v1931_v5 }
  0x1e   : > { %1728 = vmatmul.msk.f32.gmra.mxu1 %vm828_vm0, %v1931_v5 }
  0x23   : > { %1731 = vmatmul.msk.f32.vlgmr.msrb.gmra.mxu0 %vm828_vm0, %v1927_v4 }
  0x26   : > { %1735 = vmatmul.msk.f32.vlgmr.msrb.gmra.mxu1 %vm828_vm0, %v1927_v4 }
  0x2e   : > { %1736 = vmatmul.msk.f32.gmra.mxu1 %vm828_vm0, %v1931_v5 }
  0x90   : > { %v852_v6 = vpop.f32.mrf.mxu0 }
  0x91   : > { %1002 = vperm.xlu2 %1766, %v852_v6   ;;  %1120 = vperm.xlu1 %1765, %v852_v6  }
  0x92   : > { %884 = vperm.xlu0 %1764, %v852_v6  }
  0x98   : > { %v855_v7 = vpop.f32.mrf.mxu0 }
  0x99   : > { %1006 = vperm.xlu2 %1766, %v855_v7   ;;  %1124 = vperm.xlu1 %1765, %v855_v7  }
  0x9a   : > { %889 = vperm.xlu0 %1764, %v855_v7  }
  0xa1   : > { %1768 = vset.pattern.permute.xlu1 %v1807_v2  ;;  %1767 = vset.pattern.permute.xlu2 %v1807_v2 }
  0xeb   : > { %v1003_v13 = vpop.permute.xlu2 %1002 }
  0xec   : > { %v1010_v20 = vadd.f32 %v1009_v15, %v1003_v13 }
  0xee   : > { %v1014_v25 = vmul.f32 0.2, %v1010_v20  ;;  %vm1012_vm5 = vcmp.ge.f32.partialorder %v1010_v20, 0.0 }
  0xf0   : > { %v1016_v37 = vsel %vm1012_vm5, %v1010_v20, %v1014_v25  ;;  %v876_v25 = vpop.f32.mrf.mxu1 }
  0xf1   : > { %v1018_v41 = vsel %vm901_vm3, %v1016_v37, -1e+30 }
  0xf2   : > { %v1020_v47 = vsel %vm905_vm4, %v1018_v41, -inf }
  0xf3   : > { %v1007_v28 = vpop.permute.xlu2 %1006 }
  0xf4   : > { %v1011_v35 = vadd.f32 %v1009_v15, %v1007_v28 }
  0xf6   : > { %v1015_v42 = vmul.f32 0.2, %v1011_v35  ;;  %vm1013_vm9 = vcmp.ge.f32.partialorder %v1011_v35, 0.0 }
  0xf8   : > { %v1017_v49 = vsel %vm1013_vm9, %v1011_v35, %v1015_v42  ;;  %v995_v35 = vpop.f32.mrf.mxu0 }
  0xf9   : > { %v1019_v50 = vsel %vm902_vm8, %v1017_v49, -1e+30 }
  0xfa   : > { %v1023_v51 = vsel %vm905_vm4, %v1019_v50, -inf }
 0x103   : > { %v1121_v17 = vpop.permute.xlu1 %1120 }
 0x104   : > { %v1128_v18 = vadd.f32 %v1127_v14, %v1121_v17  ;;  %v885_v19 = vpop.permute.xlu0 %884 }
 0x105   : > { %v893_v21 = vadd.f32 %v892_v16, %v885_v19 }
 0x106   : > { %v1132_v22 = vmul.f32 0.2, %v1128_v18  ;;  %vm1130_vm1 = vcmp.ge.f32.partialorder %v1128_v18, 0.0 }
 0x107   : > { %v897_v23 = vmul.f32 0.2, %v893_v21  ;;  %vm895_vm2 = vcmp.ge.f32.partialorder %v893_v21, 0.0 }
 0x108   : > { %v1134_v24 = vsel %vm1130_vm1, %v1128_v18, %v1132_v22 }
 0x109   : > { %v1136_v26 = vsel %vm901_vm3, %v1134_v24, -1e+30  ;;  %v899_v27 = vsel %vm895_vm2, %v893_v21, %v897_v23  ;;  %v826_v21 = vld [vmem:[%s770_s25] sm:$0x1]  ;;  %v821_v24 = vld [vmem:[%s2013_s1 + $0x8] sm:$0xff]  ;;  %s801_s25 = scalar_lea.vmem %s2254_s15, %s2277_s28 }
 0x10a   : > { %v1138_v29 = vsel %vm905_vm4, %v1136_v26, -inf  ;;  %v903_v30 = vsel %vm901_vm3, %v899_v27, -1e+30  ;;  %v1224_v22 = vsub.f32 1.0, %v826_v21 }
 0x10b   : > { %1139 = vmax.xlane.f32.xlu2 %v1138_v29  ;;  %v1125_v31 = vpop.permute.xlu1 %1124  ;;  %v906_v32 = vsel %vm905_vm4, %v903_v30, -inf }
 0x10c   : > { %v1129_v33 = vadd.f32 %v1127_v14, %v1125_v31  ;;  %907 = vmax.xlane.f32.xlu0 %v906_v32  ;;  %v890_v34 = vpop.permute.xlu0 %889  ;;  %v1226_v23 = vperm.slane %v1224_v22, 0 }
 0x10d   : > { %v894_v36 = vadd.f32 %v892_v16, %v890_v34 }
 0x10e   : > { %v1133_v38 = vmul.f32 0.2, %v1129_v33  ;;  %vm1131_vm6 = vcmp.ge.f32.partialorder %v1129_v33, 0.0 }
 0x10f   : > { %v898_v39 = vmul.f32 0.2, %v894_v36  ;;  %vm896_vm7 = vcmp.ge.f32.partialorder %v894_v36, 0.0 }
 0x110   : > { %v1135_v40 = vsel %vm1131_vm6, %v1129_v33, %v1133_v38 }
 0x111   : > { %v1137_v43 = vsel %vm902_vm8, %v1135_v40, -1e+30  ;;  %v900_v44 = vsel %vm896_vm7, %v894_v36, %v898_v39  ;;  %v998_v36 = vpop.f32.mrf.mxu3 }
 0x112   : > { %v1141_v45 = vsel %vm905_vm4, %v1137_v43, -inf  ;;  %v904_v46 = vsel %vm902_vm8, %v900_v44, -1e+30  ;;  %v1071_v37 = vpack.c.bf16 %v998_v36, %v995_v35 }
 0x113   : > { %1142 = vmax.xlane.f32.xlu2 %v1141_v45  ;;  %v909_v48 = vsel %vm905_vm4, %v904_v46, -inf }
 0x114   : > { %1021 = vmax.xlane.f32.xlu0 %v1020_v47  ;;  %910 = vmax.xlane.f32.xlu1 %v909_v48  ;;  %v820_v47 = vld [vmem:[%s2013_s1] sm:$0xff]  ;;  %s790_s1 = scalar_lea.vmem %s2249_s10, %s2277_s28 }
 0x115   : > { %1083 = vmatpush.bf16.msra.mxu0 %v1071_v37 }
 0x11c   : > { %1024 = vmax.xlane.f32.xlu1 %v1023_v51  ;;  %v1217_v51 = vperm.slane %v826_v21, 0 }
 0x17e   : > { %v1140_v54 = vpop.xlane.xlu2 %1139 }
 0x17f   : > { %v1144_v55 = vsub.f32 %v1136_v26, %v1140_v54  ;;  %v908_v56 = vpop.xlane.xlu0 %907  ;;  %v879_v26 = vpop.f32.mrf.mxu1 }
 0x180   : > { %v912_v57 = vsub.f32 %v903_v30, %v908_v56  ;;  %v957_v27 = vpack.c.bf16 %v879_v26, %v876_v25 }
 0x181   : > { %v1146_v58 = vmul.f32 1.442695, %v1144_v55 }
 0x182   : > { %v914_v59 = vmul.f32 1.442695, %v912_v57  ;;  %969 = vmatpush.bf16.msra.mxu2 %v957_v27 }
 0x183   : > { %1771 = vpow2.f32 %v1146_v58 }
 0x184   : > { %1773 = vpow2.f32 %v914_v59 }
 0x186   : > { %v1143_v60 = vpop.xlane.xlu2 %1142 }
 0x187   : > { %v1145_v61 = vsub.f32 %v1137_v43, %v1143_v60  ;;  %v911_v62 = vpop.xlane.xlu1 %910  ;;  %v1022_v63 = vpop.xlane.xlu0 %1021 }
 0x188   : > { %v913_v0 = vsub.f32 %v904_v46, %v911_v62  ;;  %v1026_v6 = vsub.f32 %v1018_v41, %v1022_v63  ;;  %v1113_v28 = vpop.f32.mrf.mxu1 }
 0x189   : > { %v1981_v1 = vpop.eup %1771  ;;  %v1148_v2 = vmul.f32 1.442695, %v1145_v61  ;;  %v823_v61 = vld [vmem:[%s2038_s22 + $0x8] sm:$0xff] }
 0x18a   : > { %v1983_v3 = vpop.eup %1773  ;;  %v916_v5 = vmul.f32 1.442695, %v913_v0  ;;  %v1150_v4 = vsel %vm905_vm4, %v1981_v1, 0.0  ;;  %v1028_v8 = vmul.f32 1.442695, %v1026_v6 }
 0x18b   : > { %1775 = vpow2.f32 %v1148_v2  ;;  %1151 = vadd.xlane.f32.xlu1 %v1150_v4  ;;  %v918_v7 = vsel %vm905_vm4, %v1983_v3, 0.0 }
 0x18c   : > { %1777 = vpow2.f32 %v916_v5  ;;  %919 = vadd.xlane.f32.xlu2 %v918_v7 }
 0x18d   : > { %1779 = vpow2.f32 %v1028_v8 }
 0x18f   : > { %v1025_v9 = vpop.xlane.xlu1 %1024 }
 0x190   : > { %v1027_v11 = vsub.f32 %v1019_v50, %v1025_v9  ;;  %v1116_v29 = vpop.f32.mrf.mxu1 }
 0x191   : > { %v1989_v12 = vpop.eup %1775  ;;  %v1189_v30 = vpack.c.bf16 %v1116_v29, %v1113_v28 }
 0x192   : > { %v1991_v13 = vpop.eup %1777  ;;  %v1030_v14 = vmul.f32 1.442695, %v1027_v11  ;;  %v1153_v15 = vsel %vm905_vm4, %v1989_v12, 0.0 }
 0x193   : > { %v921_v16 = vsel %vm905_vm4, %v1991_v13, 0.0  ;;  %v1997_v17 = vpop.eup %1779  ;;  %1201 = vmatpush.bf16.msrb.mxu3 %v1189_v30 }
 0x194   : > { %1781 = vpow2.f32 %v1030_v14  ;;  %922 = vadd.xlane.f32.xlu0 %v921_v16  ;;  %1154 = vadd.xlane.f32.xlu2 %v1153_v15  ;;  %v1032_v20 = vsel %vm905_vm4, %v1997_v17, 0.0 }
 0x19a   : > { %v1999_v18 = vpop.eup %1781 }
 0x19b   : > { %v1035_v19 = vsel %vm905_vm4, %v1999_v18, 0.0 }
 0x19c   : > { %1036 = vadd.xlane.f32.xlu1 %v1035_v19  ;;  %1033 = vadd.xlane.f32.xlu0 %v1032_v20  ;;  %v822_v19 = vld [vmem:[%s2038_s22] sm:$0xff]  ;;  %s809_s22 = scalar_lea.vmem %s2256_s17, %s2277_s28 }
 0x1ac   : > { %1219 = vperm.xlu2 %1767, %v1217_v51  }
 0x1b0   : > { %1228 = vperm.xlu0 %1764, %v1226_v23  }
 0x1b4   : > { %1270 = vperm.xlu2 %1767, %v822_v19  }
 0x1b5   : > { %1240 = vperm.xlu1 %1768, %v820_v47  }
 0x1b8   : > { %1245 = vperm.xlu0 %1764, %v821_v24  }
 0x1bd   : > { %1275 = vperm.xlu1 %1768, %v823_v61  }
 0x1fe   : > { %v1152_v31 = vpop.xlane.xlu1 %1151 }
 0x1ff   : > { %v1156_v32 = vmax.f32 %v1152_v31, 1e-30  ;;  %v920_v33 = vpop.xlane.xlu2 %919 }
 0x200   : > { %v2016_v34 = vmax.f32 %v920_v33, 1e-30 }
 0x201   : > { %1783 = vrcp.f32 %v1156_v32  ;;  %v1169_v50 = vand.u32 2147483648, %v1156_v32  ;;  %vm1163_vm10 = vweird.f32 %v1156_v32  ;;  %v1167_v53 = vand.u32 2147483647, %v1156_v32 }
 0x202   : > { %1785 = vrcp.f32 %v2016_v34  ;;  %v935_v56 = vand.u32 2147483647, %v2016_v34  ;;  %vm931_vm11 = vweird.f32 %v2016_v34  ;;  %v937_v60 = vand.u32 2147483648, %v2016_v34 }
 0x203   : > { %v1170_v63 = vor.u32 1.1754944e-38, %v1169_v50  ;;  %vm2058_vm14 = vcmp.eq.f32.partialorder %v1167_v53, 8.507059e+37 }
 0x204   : > { %vm2068_vm1 = vcmp.eq.f32.partialorder %v935_v56, 8.507059e+37  ;;  %v938_v26 = vor.u32 1.1754944e-38, %v937_v60 }
 0x207   : > { %v2019_v38 = vpop.eup %1783  ;;  %v1155_v39 = vpop.xlane.xlu2 %1154 }
 0x208   : > { %v923_v40 = vpop.xlane.xlu0 %922  ;;  %v2021_v41 = vpop.eup %1785  ;;  %v1159_v42 = vmul.f32 %v2019_v38, %v1156_v32  ;;  %v2024_v43 = vmax.f32 %v1155_v39, 1e-30  ;;  %vm1164_vm12 = vweird.f32 %v2019_v38 }
 0x209   : > { %v2026_v44 = vmax.f32 %v923_v40, 1e-30  ;;  %v927_v45 = vmul.f32 %v2021_v41, %v2016_v34  ;;  %vm932_vm13 = vweird.f32 %v2021_v41  ;;  %vm2063_vm15 = vmor %vm1163_vm10, %vm1164_vm12 }
 0x20a   : > { %v1160_v46 = vsub.f32 1.0, %v1159_v42  ;;  %1787 = vrcp.f32 %v2024_v43  ;;  %v1182_v7 = vand.u32 2147483647, %v2024_v43  ;;  %v1184_v11 = vand.u32 2147483648, %v2024_v43  ;;  %vm2076_vm3 = vmor %vm931_vm11, %vm932_vm13 }
 0x20b   : > { %v928_v48 = vsub.f32 1.0, %v927_v45  ;;  %1789 = vrcp.f32 %v2026_v44  ;;  %v950_v16 = vand.u32 2147483647, %v2026_v44  ;;  %v952_v22 = vand.u32 2147483648, %v2026_v44 }
 0x20c   : > { %v1161_v49 = vmul.f32 %v2019_v38, %v1160_v46  ;;  %vm1178_vm6 = vweird.f32 %v2024_v43  ;;  %vm946_vm7 = vweird.f32 %v2026_v44  ;;  %vm2089_vm8 = vcmp.eq.f32.partialorder %v1182_v7, 8.507059e+37 }
 0x20d   : > { %v929_v52 = vmul.f32 %v2021_v41, %v928_v48  ;;  %v1185_v30 = vor.u32 1.1754944e-38, %v1184_v11  ;;  %vm951_vm10 = vcmp.eq.f32.partialorder %v950_v16, 8.507059e+37  ;;  %v953_v36 = vor.u32 1.1754944e-38, %v952_v22 }
 0x20e   : > { %v1162_v2 = vadd.f32 %v2019_v38, %v1161_v49 }
 0x20f   : > { %v1037_v54 = vpop.xlane.xlu1 %1036  ;;  %v930_v6 = vadd.f32 %v2021_v41, %v929_v52 }
 0x210   : > { %v1034_v55 = vpop.xlane.xlu0 %1033  ;;  %v1788_v57 = vpop.eup %1787  ;;  %v2042_v58 = vmax.f32 %v1037_v54, 1e-30  ;;  %v1166_v23 = vsel %vm2063_vm15, %v2019_v38, %v1162_v2 }
 0x211   : > { %v2044_v59 = vmax.f32 %v1034_v55, 1e-30  ;;  %v1790_v62 = vpop.eup %1789  ;;  %v1174_v0 = vmul.f32 %v1788_v57, %v2024_v43  ;;  %vm1179_vm2 = vweird.f32 %v1788_v57  ;;  %v934_v25 = vsel %vm2076_vm3, %v2021_v41, %v930_v6 }
 0x212   : > { %v942_v5 = vmul.f32 %v1790_v62, %v2026_v44  ;;  %1791 = vrcp.f32 %v2042_v58  ;;  %vm947_vm5 = vweird.f32 %v1790_v62  ;;  %vm1180_vm9 = vmor %vm1178_vm6, %vm1179_vm2  ;;  %v1171_v32 = vsel %vm2058_vm14, %v1170_v63, %v1166_v23 }
 0x213   : > { %v1175_v4 = vsub.f32 1.0, %v1174_v0  ;;  %1793 = vrcp.f32 %v2044_v59  ;;  %v939_v35 = vsel %vm2068_vm1, %v938_v26, %v934_v25  ;;  %vm948_vm11 = vmor %vm946_vm7, %vm947_vm5  ;;  %v1064_v38 = vand.u32 2147483647, %v2042_v58 }
 0x214   : > { %v943_v14 = vsub.f32 1.0, %v942_v5  ;;  %v1172_v44 = vmul.f32 %v1981_v1, %v1171_v32  ;;  %v1066_v46 = vand.u32 2147483648, %v2042_v58  ;;  %v940_v48 = vmul.f32 %v1983_v3, %v939_v35 }
 0x215   : > { %v1176_v20 = vmul.f32 %v1788_v57, %v1175_v4  ;;  %v1051_v51 = vand.u32 2147483648, %v2044_v59  ;;  %v1049_v54 = vand.u32 2147483647, %v2044_v59  ;;  %vm1060_vm14 = vweird.f32 %v2042_v58 }
 0x216   : > { %v944_v24 = vmul.f32 %v1790_v62, %v943_v14  ;;  %vm1045_vm1 = vweird.f32 %v2044_v59  ;;  %vm1065_vm3 = vcmp.eq.f32.partialorder %v1064_v38, 8.507059e+37  ;;  %vm1288_vm6 = vcmask 1043456  }
 0x217   : > { %v1177_v27 = vadd.f32 %v1788_v57, %v1176_v20  ;;  %vm1050_vm5 = vcmp.eq.f32.partialorder %v1049_v54, 8.507059e+37  ;;  %v1323_v54 = vld [vmem:[%s2250_s11 + $0x78] sm:$0xff] }
 0x218   : > { %v1792_v29 = vpop.eup %1791  ;;  %v945_v31 = vadd.f32 %v1790_v62, %v944_v24 }
 0x219   : > { %v1794_v33 = vpop.eup %1793  ;;  %v1056_v34 = vmul.f32 %v1792_v29, %v2042_v58  ;;  %v1181_v37 = vsel %vm1180_vm9, %v1788_v57, %v1177_v27  ;;  %vm1061_vm12 = vweird.f32 %v1792_v29  ;;  %v1220_v27 = vpop.permute.xlu2 %1219 }
 0x21a   : > { %v1041_v39 = vmul.f32 %v1794_v33, %v2044_v59  ;;  %v949_v40 = vsel %vm948_vm11, %v1790_v62, %v945_v31  ;;  %v1186_v41 = vsel %vm2089_vm8, %v1185_v30, %v1181_v37  ;;  %vm1046_vm13 = vweird.f32 %v1794_v33  ;;  %vm1062_vm15 = vmor %vm1060_vm14, %vm1061_vm12 }
 0x21b   : > { %v1057_v42 = vsub.f32 1.0, %v1056_v34  ;;  %v954_v43 = vsel %vm951_vm10, %v953_v36, %v949_v40  ;;  %v1187_v45 = vmul.f32 %v1989_v12, %v1186_v41  ;;  %v1067_v12 = vor.u32 1.1754944e-38, %v1066_v46  ;;  %vm1047_vm2 = vmor %vm1045_vm1, %vm1046_vm13 }
 0x21c   : > { %v1042_v47 = vsub.f32 1.0, %v1041_v39  ;;  %v955_v49 = vmul.f32 %v1991_v13, %v954_v43  ;;  %v1052_v13 = vor.u32 1.1754944e-38, %v1051_v51  ;;  %v1236_v43 = vld [vmem:[%s787_s2] sm:$0xff] }
 0x21d   : > { %v1058_v50 = vmul.f32 %v1792_v29, %v1057_v42  ;;  %v1188_v52 = vpack.c.bf16 %v1187_v45, %v1172_v44 }
 0x21e   : > { %v1043_v53 = vmul.f32 %v1794_v33, %v1042_v47  ;;  %v956_v55 = vpack.c.bf16 %v955_v49, %v940_v48 }
 0x21f   : > { %v1059_v1 = vadd.f32 %v1792_v29, %v1058_v50  ;;  %1737 = vmatmul.msk.bf16.vlgmr.msrb.gmra.mxu3 %vm905_vm4, %v1188_v52 }
 0x220   : > { %v1044_v3 = vadd.f32 %v1794_v33, %v1043_v53  ;;  %1729 = vmatmul.msk.bf16.vlgmr.msra.gmra.mxu2 %vm905_vm4, %v956_v55  ;;  %v1322_v53 = vld [vmem:[%s2250_s11 + $0x70] sm:$0xff]  ;;  %v1320_v55 = vld [vmem:[%s2250_s11 + $0x60] sm:$0xff] }
 0x221   : > { %v1063_v56 = vsel %vm1062_vm15, %v1792_v29, %v1059_v1  ;;  %v1271_v47 = vpop.permute.xlu2 %1270  ;;  %v1352_v1 = vpack.c.bf16 %v1323_v54, %v1322_v53 }
 0x222   : > { %v1048_v57 = vsel %vm1047_vm2, %v1794_v33, %v1044_v3  ;;  %v1068_v60 = vsel %vm1065_vm3, %v1067_v12, %v1063_v56  ;;  %v1229_v26 = vpop.permute.xlu0 %1228  ;;  %v1321_v12 = vld [vmem:[%s2250_s11 + $0x68] sm:$0xff]  ;;  %v1319_v56 = vld [vmem:[%s2250_s11 + $0x58] sm:$0xff] }
 0x223   : > { %v1053_v61 = vsel %vm1050_vm5, %v1052_v13, %v1048_v57  ;;  %v1069_v58 = vmul.f32 %v1999_v18, %v1068_v60  ;;  %1356 = vmatpush.bf16.msra.mxu3 %v1352_v1  ;;  %v1351_v3 = vpack.c.bf16 %v1321_v12, %v1320_v55  ;;  %v1318_v13 = vld [vmem:[%s2250_s11 + $0x50] sm:$0xff]  ;;  %v1316_v60 = vld [vmem:[%s2250_s11 + $0x40] sm:$0xff] }
 0x224   : > { %v1054_v62 = vmul.f32 %v1997_v17, %v1053_v61  ;;  %v825_v17 = vld [vmem:[%s783_s26] sm:$0x7]  ;;  %v1350_v57 = vpack.c.bf16 %v1319_v56, %v1318_v13  ;;  %v1317_v61 = vld [vmem:[%s2250_s11 + $0x48] sm:$0xff] }
 0x225   : > { %v1093_v63 = vmax.f32 %v955_v49, %v1069_v58  ;;  %v958_v18 = vperm.slane %v825_v17, 0  ;;  %v1072_v6 = vperm.slane %v825_v17, 1  ;;  %v1190_v8 = vperm.slane %v825_v17, 2 }
 0x226   : > { %v1092_v0 = vmax.f32 %v940_v48, %v1054_v62  ;;  %v1070_v59 = vpack.c.bf16 %v1069_v58, %v1054_v62  ;;  %v1349_v58 = vpack.c.bf16 %v1317_v61, %v1316_v60 }
 0x227   : > { %v1211_v2 = vmax.f32 %v1093_v63, %v1187_v45  ;;  %v1241_v37 = vpop.permute.xlu1 %1240  ;;  %1357 = vmatpush.bf16.msra.mxu3 %v1351_v3  ;;  %v1314_v63 = vld [vmem:[%s2250_s11 + $0x30] sm:$0xff] }
 0x228   : > { %v1210_v5 = vmax.f32 %v1092_v0, %v1172_v44  ;;  %1733 = vmatmul.msk.bf16.vlgmr.msra.gmra.mxu0 %vm905_vm4, %v1070_v59  ;;  %v1281_v44 = vpack.c.bf16 %v1236_v43, %v1236_v43  ;;  %v1315_v0 = vld [vmem:[%s2250_s11 + $0x38] sm:$0xff]  ;;  %v1769_v59 = vld [vmem:[%s790_s1] ss:$0 sm:$0xff] }
 0x229   : > { %1213 = vst.msk [vmem:[%s806_s29 + $0x8] sm:$0xff] %vm905_vm4, %v1211_v2  ;;  %v1348_v2 = vpack.c.bf16 %v1315_v0, %v1314_v63  ;;  %v1390_v43 = vld [vmem:[%s2199_s24] sm:$0xff] }
 0x22a   : > { %1212 = vst.msk [vmem:[%s806_s29] sm:$0xff] %vm905_vm4, %v1210_v5  ;;  %v1246_v39 = vpop.permute.xlu0 %1245  ;;  %v1290_v45 = vsel %vm1288_vm6, %v1281_v44, 0  ;;  %v1770_v44 = vld [vmem:[%s2251_s12] ss:$0 sm:$0xff]  ;;  %s798_s29 = scalar_lea.vmem %s2253_s14, %s2277_s28 }
 0x22b   : > { %1299 = vmatpush.bf16.msrb.mxu0 %v1290_v45  ;;  %1358 = vmatpush.bf16.msra.mxu3 %v1350_v57  ;;  %v1808_v45 = vmov 16.0   ;;  %v1406_v63 = vld [vmem:[%s798_s29] sm:$0x1] }
 0x22c   : > { %1795 = vrcp.f32 %v1808_v45 }
 0x22f   : > { %v1276_v48 = vpop.permute.xlu1 %1275  ;;  %1359 = vmatpush.bf16.msra.mxu3 %v1349_v58 }
 0x233   : > { %1360 = vmatpush.bf16.msra.mxu3 %v1348_v2 }
 0x2a2   : > { %v1203_v7 = vpop.f32.mrf.mxu3 }
 0x2a3   : > { %v971_v4 = vpop.f32.mrf.mxu2  ;;  %v1204_v15 = vadd.f32 %v1203_v7, %v1190_v8 }
 0x2a4   : > { %v972_v11 = vadd.f32 %v971_v4, %v958_v18 }
 0x2a5   : > { %v1085_v9 = vpop.f32.mrf.mxu0 }
 0x2a6   : > { %v1086_v14 = vadd.f32 %v1085_v9, %v1072_v6 }
 0x2a8   : > { %v1090_v16 = vmax.f32 %v972_v11, %v1086_v14  ;;  %v1312_v11 = vld [vmem:[%s2250_s11 + $0x20] sm:$0xff]  ;;  %v1313_v14 = vld [vmem:[%s2250_s11 + $0x28] sm:$0xff] }
 0x2aa   : > { %v1208_v19 = vmax.f32 %v1090_v16, %v1204_v15  ;;  %v1205_v21 = vpop.f32.mrf.mxu3  ;;  %v1310_v15 = vld [vmem:[%s2250_s11 + $0x10] sm:$0xff]  ;;  %v1347_v16 = vpack.c.bf16 %v1313_v14, %v1312_v11 }
 0x2ab   : > { %v973_v20 = vpop.f32.mrf.mxu2  ;;  %v1206_v28 = vadd.f32 %v1205_v21, %v1190_v8  ;;  %v1309_v21 = vld [vmem:[%s2250_s11 + $0x8] sm:$0xff] }
 0x2ac   : > { %v974_v23 = vadd.f32 %v973_v20, %v958_v18  ;;  %v1214_v24 = vmax.f32 %v1208_v19, 0.0  ;;  %v1231_v33 = vmul.f32 %v1229_v26, %v1208_v19  ;;  %v1311_v19 = vld [vmem:[%s2250_s11 + $0x18] sm:$0xff]  ;;  %1361 = vmatpush.bf16.msra.mxu3 %v1347_v16 }
 0x2ad   : > { %v1087_v22 = vpop.f32.mrf.mxu0  ;;  %v1346_v20 = vpack.c.bf16 %v1311_v19, %v1310_v15 }
 0x2ae   : > { %v1088_v25 = vadd.f32 %v1087_v22, %v1072_v6  ;;  %v1222_v30 = vmul.f32 %v1220_v27, %v1214_v24 }
 0x2b0   : > { %v1091_v29 = vmax.f32 %v974_v23, %v1088_v25  ;;  %v1233_v35 = vadd.f32 %v1231_v33, %v1222_v30  ;;  %1362 = vmatpush.bf16.msra.mxu3 %v1346_v20  ;;  %v1405_v23 = vld [vmem:[%s2199_s24 + $0x78] sm:$0xff]  ;;  %v1403_v30 = vld [vmem:[%s2199_s24 + $0x68] sm:$0xff]  ;;  %v1400_v33 = vld [vmem:[%s2199_s24 + $0x50] sm:$0xff] }
 0x2b2   : > { %v1209_v31 = vmax.f32 %v1091_v29, %v1206_v28  ;;  %v1248_v40 = vmul.f32 %v1241_v37, %v1233_v35  ;;  %v1404_v29 = vld [vmem:[%s2199_s24 + $0x70] sm:$0xff]  ;;  %v1398_v35 = vld [vmem:[%s2199_s24 + $0x40] sm:$0xff] }
 0x2b4   : > { %v1215_v32 = vmax.f32 %v1209_v31, 0.0  ;;  %v1232_v34 = vmul.f32 %v1229_v26, %v1209_v31  ;;  %v1402_v31 = vld [vmem:[%s2199_s24 + $0x60] sm:$0xff] }
 0x2b6   : > { %v1223_v36 = vmul.f32 %v1220_v27, %v1215_v32  ;;  %v1401_v32 = vld [vmem:[%s2199_s24 + $0x58] sm:$0xff] }
 0x2b8   : > { %v1234_v38 = vadd.f32 %v1232_v34, %v1223_v36  ;;  %v1399_v34 = vld [vmem:[%s2199_s24 + $0x48] sm:$0xff]  ;;  %v1397_v36 = vld [vmem:[%s2199_s24 + $0x38] sm:$0xff] }
 0x2ba   : > { %v1249_v41 = vmul.f32 %v1246_v39, %v1234_v38  ;;  %v1395_v38 = vld [vmem:[%s2199_s24 + $0x28] sm:$0xff] }
 0x2bc   : > { %v1250_v42 = vpack.c.bf16 %v1249_v41, %v1248_v40  ;;  %v1393_v40 = vld [vmem:[%s2199_s24 + $0x18] sm:$0xff]  ;;  %v1392_v41 = vld [vmem:[%s2199_s24 + $0x10] sm:$0xff] }
 0x2be   : > { %1261 = vmatpush.bf16.msrb.mxu2 %v1250_v42  ;;  %v1391_v42 = vld [vmem:[%s2199_s24 + $0x8] sm:$0xff] }
 0x2c1   : > { %1738 = vmatmul.msk.bf16.vlgmr.msrb.gmra.mxu2 %vm905_vm4, %v1942_v10 }
 0x2c2   : > { %1407 = vmatpush.msra.mxu2 %v1405_v23 }
 0x2c4   : > { %1408 = vmatpush.msra.mxu2 %v1404_v29 }
 0x2c6   : > { %1409 = vmatpush.msra.mxu2 %v1403_v30 }
 0x2c8   : > { %1410 = vmatpush.msra.mxu2 %v1402_v31 }
 0x2ca   : > { %1411 = vmatpush.msra.mxu2 %v1401_v32 }
 0x2cc   : > { %1412 = vmatpush.msra.mxu2 %v1400_v33 }
 0x2ce   : > { %1413 = vmatpush.msra.mxu2 %v1399_v34 }
 0x2d0   : > { %1414 = vmatpush.msra.mxu2 %v1398_v35 }
 0x2d2   : > { %1415 = vmatpush.msra.mxu2 %v1397_v36 }
 0x344   : > { %v1263_v46 = vpop.f32.mrf.mxu2 }
 0x345   : > { %v1278_v50 = vmul.f32 %v1271_v47, %v1263_v46 }
 0x34c   : > { %v1265_v49 = vpop.f32.mrf.mxu2 }
 0x34d   : > { %v1279_v51 = vmul.f32 %v1276_v48, %v1265_v49  ;;  %v1796_v49 = vpop.eup %1795 }
 0x34f   : > { %v1280_v52 = vpack.c.bf16 %v1279_v51, %v1278_v50  ;;  %v1382_v51 = vmul.f32 16.0, %v1796_v49 }
 0x351   : > { %1739 = vmatmul.msk.bf16.vlgmr.msrb.gmra.mxu0 %vm828_vm0, %v1280_v52  ;;  %v1383_v54 = vsub.f32 1.0, %v1382_v51  ;;  %vm1386_vm0 = vweird.f32 %v1796_v49 }
 0x353   : > { %v1384_v12 = vmul.f32 %v1796_v49, %v1383_v54 }
 0x355   : > { %v1385_v56 = vadd.f32 %v1796_v49, %v1384_v12 }
 0x357   : > { %v1387_v61 = vsel %vm1386_vm0, %v1796_v49, %v1385_v56 }
 0x3ce   : > { %v1301_v62 = vpop.f32.mrf.mxu0 }
 0x3cf   : > { %v1302_v5 = vadd.f32 %v1769_v59, %v1301_v62 }
 0x3d1   : > { %v1306_v18 = vmax.f32 %v1302_v5, 0.0 }
 0x3d3   : > { %v1325_v7 = vmul.f32 %v1306_v18, %v1241_v37  ;;  %v1396_v37 = vld [vmem:[%s2199_s24 + $0x30] sm:$0xff] }
 0x3d4   : > { %1416 = vmatpush.msra.mxu2 %v1396_v37 }
 0x3d6   : > { %v1303_v17 = vpop.f32.mrf.mxu0  ;;  %1417 = vmatpush.msra.mxu2 %v1395_v38 }
 0x3d7   : > { %v1304_v6 = vadd.f32 %v1769_v59, %v1303_v17 }
 0x3d9   : > { %v1307_v4 = vmax.f32 %v1304_v6, 0.0 }
 0x3db   : > { %v1326_v8 = vmul.f32 %v1307_v4, %v1246_v39  ;;  %v1394_v39 = vld [vmem:[%s2199_s24 + $0x20] sm:$0xff] }
 0x3dc   : > { %1418 = vmatpush.msra.mxu2 %v1394_v39 }
 0x3dd   : > { %v1327_v9 = vpack.c.bf16 %v1326_v8, %v1325_v7 }
 0x3de   : > { %1419 = vmatpush.msra.mxu2 %v1393_v40 }
 0x3df   : > { %1335 = vmatpush.bf16.msra.mxu1 %v1327_v9 }
 0x3e0   : > { %1420 = vmatpush.msra.mxu2 %v1392_v41 }
 0x3e2   : > { %1740 = vmatmul.msk.bf16.vlgmr.msra.gmra.mxu1 %vm905_vm4, %v1942_v10  ;;  %v1308_v10 = vld [vmem:[%s2250_s11] sm:$0xff]  ;;  %1421 = vmatpush.msra.mxu2 %v1391_v42 }
 0x3e3   : > { %v1345_v22 = vpack.c.bf16 %v1309_v21, %v1308_v10 }
 0x3e4   : > { %1422 = vmatpush.msra.mxu2 %v1390_v43 }
 0x3e5   : > { %1363 = vmatpush.bf16.msra.mxu3 %v1345_v22 }
 0x45f   : > { %v1337_v24 = vpop.f32.mrf.mxu1 }
 0x460   : > { %v1342_v26 = vmul.f32 %v1337_v24, %v1271_v47 }
 0x467   : > { %v1339_v25 = vpop.f32.mrf.mxu1 }
 0x468   : > { %v1343_v27 = vmul.f32 %v1339_v25, %v1276_v48 }
 0x46a   : > { %v1344_v28 = vpack.c.bf16 %v1343_v27, %v1342_v26 }
 0x46c   : > { %1364 = vmatmul.bf16.vlgmr.msra.gmra.mxu3 %v1344_v28 }
 0x4ef   : > { %v1365_v46 = vpop.f32.mrf.mxu3 }
 0x4f0   : > { %v1366_v47 = vadd.f32 %v1770_v44, %v1365_v46 }
 0x4f2   : > { %v1370_v48 = vmax.f32 %v1366_v47, 0.0 }
 0x4f4   : > { %1372 = vst [vmem:[%s814_s20] sm:$0xff] %v1370_v48 }
 0x4f7   : > { %v1367_v50 = vpop.f32.mrf.mxu3 }
 0x4f8   : > { %v1368_v52 = vadd.f32 %v1770_v44, %v1367_v50 }
 0x4fa   : > { %v1371_v53 = vmax.f32 %v1368_v52, 0.0 }
 0x4fc   : > { %1373 = vst [vmem:[%s814_s20 + $0x8] sm:$0xff] %v1371_v53  ;;  %v1374_v55 = vadd.f32 %v1371_v53, %v1370_v48 }
 0x4fe   : > { %v1375_v1 = vrot.slane %v1374_v55, 4 }
 0x500   : > { %v1376_v3 = vadd.f32 %v1375_v1, %v1374_v55 }
 0x502   : > { %v1377_v13 = vrot.slane %v1376_v3, 2 }
 0x504   : > { %v1378_v57 = vadd.f32 %v1377_v13, %v1376_v3 }
 0x506   : > { %v1379_v60 = vrot.slane %v1378_v57, 1 }
 0x508   : > { %v1380_v58 = vadd.f32 %v1379_v60, %v1378_v57 }
 0x50a   : > { %v1388_v62 = vmul.f32 %v1387_v61, %v1380_v58 }
 0x50c   : > { %1389 = vst [vmem:[%s809_s22] sm:$0x1] %v1388_v62  ;;  %1423 = vmatmul.f32.vlgmr.msra.gmra.mxu2 %v1388_v62 }
 0x58f   : > { %v1424_v0 = vpop.f32.mrf.mxu2 }
 0x590   : > { %v1425_v59 = vadd.f32 %v1424_v0, %v1406_v63 }
 0x592   : > { %1427 = vst [vmem:[%s801_s25] sm:$0x1] %v1425_v59 }
 0x593 PF: > { %s29_s27 = sadd.s32 1, %s1803_s27  }
 0x594   : > { %p26_p4 = scmp.ge.s32.totalorder %s29_s27, 5  }
 0x596   :  { %28 = sbr.rel (!%p26_p4) target bundleno = 4 (0x4), region = 184 }

</bundles_post_ra>
